<compile_context>
chip_gen: v7x
topology: tpu7x:2x2x1
jax: 0.10.0
libtpu: 0.0.40
codegen_flags: <defaults>
</compile_context>

<pallas_src>
import math
from functools import partial

import jax
import jax.numpy as jnp
import numpy as np
from jax.experimental import pallas as pl
from jax.experimental.pallas import tpu as pltpu


def _corr_kernel(in1_ref, in2_ref, out_ref, p1s_ref, p2s_ref, *,
                 top_h, top_w, kernel_size, pad_size, max_disp, stride2,
                 ngr, ngw, inv_sumelems):
    """One batch image per grid step.

    in1_ref, in2_ref : (C, H, W) unpadded NCHW slices (W on lanes)
    out_ref          : (D, top_h, top_w) with D = ngw * ngw
    p1s_ref          : (C, Hp, Wp + 2*max_disp) f32 padded/widened p1 scratch
    p2s_ref          : (C, Hp, Wp) f32 padded p2 scratch
    """
    K = kernel_size
    md = max_disp
    C, H, W = in1_ref.shape
    Hc = top_h + K - 1
    Wp = p2s_ref.shape[-1]          # padded width

    # --- Build the zero-padded images in VMEM (no host-side jnp.pad pass). ---
    # Zero every step: cheap (a few dozen vreg stores) and stays correct when
    # the parallel batch axis is split across cores (each core has its own
    # scratch, so a "zero only at program_id==0" init would be unsafe).
    p1s_ref[...] = jnp.zeros_like(p1s_ref)
    p2s_ref[...] = jnp.zeros_like(p2s_ref)
    # Normalization 1/(K*K*C) folded into p1 once per batch instead of scaling
    # every (displacement, y, x) output element.
    p1s_ref[:, pad_size:pad_size + H, md + pad_size:md + pad_size + W] = (
        in1_ref[...].astype(jnp.float32) * inv_sumelems)
    p2s_ref[:, pad_size:pad_size + H, pad_size:pad_size + W] = (
        in2_ref[...].astype(jnp.float32))

    # --- Displacement loops: fully unrolled (ngw is small & static) so every
    # slice offset and the output index are static. dx is the outer loop so the
    # lane-shifted p1 window is loaded once per dx (ngw per batch); the per-dy
    # p2 window is a plain sublane-offset ref load (no lane rotation at all). ---
    for dxi in range(ngw):
        s2o = (dxi - ngr) * stride2
        # p1_shift[c, u, w] = p1_pad[c, md+u, w - s2o]  (full output-frame width)
        p1x = p1s_ref[:, md:md + Hc, md - s2o:md - s2o + Wp]
        for dyi in range(ngw):
            off_y = md + (dyi - ngr) * stride2
            p2_rows = p2s_ref[:, off_y:off_y + Hc, :]
            # Channel contraction: VPU multiply-adds over the leading axis.
            # TODO(synk): route through the MXU for large-C feature maps.
            cd = jnp.sum(p1x * p2_rows, axis=0)            # (Hc, Wp) f32
            # Separable K x K patch (box) sum: K + K shifted adds.
            rows = cd[0:top_h, :]
            for j in range(1, K):
                rows = rows + cd[j:j + top_h, :]
            base = md + s2o
            acc = rows[:, base:base + top_w]
            for i in range(1, K):
                acc = acc + rows[:, base + i:base + i + top_w]
            out_ref[dyi * ngw + dxi, :, :] = acc.astype(out_ref.dtype)


def correlation(input1, input2, *, pad_size, kernel_size, max_displacement,
                stride1=1, stride2=2, corr_multiply=1):
    """Pallas TPU implementation of the FlowNet2 Correlation forward pass."""
    assert input1.shape == input2.shape and input1.dtype == input2.dtype
    # TODO(synk): stride1 > 1 would need strided slicing inside the kernel.
    assert stride1 == 1, "stride1 != 1 not supported by this kernel"
    # Even K would read one row/col past the padded block (no VMEM bounds check).
    assert kernel_size >= 1 and kernel_size % 2 == 1, \
        "kernel_size must be odd (padding is sized for odd K)"
    # corr_multiply is carried by the PyTorch module but unused by the CUDA
    # forward; it is intentionally ignored here as well.
    B, C, H, W = input1.shape

    kr = (kernel_size - 1) // 2
    border = max_displacement + kr
    Hp, Wp = H + 2 * pad_size, W + 2 * pad_size
    top_h = int(math.ceil((Hp - 2 * border) / stride1))
    top_w = int(math.ceil((Wp - 2 * border) / stride1))
    assert top_h >= 1 and top_w >= 1, "output spatial size must be positive"
    ngr = max_displacement // stride2
    ngw = 2 * ngr + 1
    D = ngw * ngw
    md = max_displacement
    sumelems = kernel_size * kernel_size * C
    Hc = top_h + kernel_size - 1
    Wp1 = Wp + 2 * md                      # widened p1 scratch (hoisted x-shifts)

    kernel = partial(_corr_kernel, top_h=top_h, top_w=top_w,
                     kernel_size=kernel_size, pad_size=pad_size,
                     max_disp=md, stride2=stride2, ngr=ngr, ngw=ngw,
                     inv_sumelems=1.0 / float(sumelems))

    # Honest VMEM budget: double-buffered raw input/output blocks, the two
    # persistent padded scratches, and the f32 working set of the unrolled body.
    itemsize = int(jnp.dtype(input1.dtype).itemsize)
    in_blocks = 2 * 2 * C * H * W * itemsize          # 2 inputs x double buffer
    out_blocks = 2 * D * top_h * top_w * itemsize     # double-buffered output
    scratch = (C * Hp * Wp1 + C * Hp * Wp) * 4        # padded f32 scratches
    work = (2 * C + 8) * Hc * Wp * 4                  # p1x + p2_rows + temps
    vmem_need = in_blocks + out_blocks + scratch + work + (2 << 20)
    try:
        vmem_cap = int(pltpu.get_tpu_info().vmem_capacity_bytes)
    except Exception:
        vmem_cap = 64 << 20                           # conservative (v7x-sized)
    vmem_limit = int(min(max(vmem_need, 32 << 20), int(0.85 * vmem_cap)))

    grid_spec = pltpu.PrefetchScalarGridSpec(
        num_scalar_prefetch=0,
        grid=(B,),
        in_specs=[
            pl.BlockSpec((None, C, H, W), lambda b: (b, 0, 0, 0)),
            pl.BlockSpec((None, C, H, W), lambda b: (b, 0, 0, 0)),
        ],
        out_specs=pl.BlockSpec((None, D, top_h, top_w),
                               lambda b: (b, 0, 0, 0)),
        scratch_shapes=[
            pltpu.VMEM((C, Hp, Wp1), jnp.float32),    # padded + widened p1
            pltpu.VMEM((C, Hp, Wp), jnp.float32),     # padded p2
        ],
    )

    return pl.pallas_call(
        kernel,
        out_shape=jax.ShapeDtypeStruct((B, D, top_h, top_w), input1.dtype),
        grid_spec=grid_spec,
        compiler_params=pltpu.CompilerParams(
            dimension_semantics=("parallel",),        # shard batches across cores
            vmem_limit_bytes=vmem_limit),
    )(input1, input2)


class Correlation:
    """Drop-in analogue of the PyTorch Correlation Module (forward only)."""

    def __init__(self, pad_size=0, kernel_size=0, max_displacement=0,
                 stride1=1, stride2=2, corr_multiply=1):
        self.pad_size = pad_size
        self.kernel_size = kernel_size
        self.max_displacement = max_displacement
        self.stride1 = stride1
        self.stride2 = stride2
        self.corr_multiply = corr_multiply

    def __call__(self, input1, input2):
        return correlation(input1, input2,
                           pad_size=self.pad_size,
                           kernel_size=self.kernel_size,
                           max_displacement=self.max_displacement,
                           stride1=self.stride1,
                           stride2=self.stride2,
                           corr_multiply=self.corr_multiply)


def correlation_reference(input1, input2, *, pad_size, kernel_size,
                          max_displacement, stride1=1, stride2=2,
                          corr_multiply=1):
    """Pure-JAX reference of the same semantics (for verification)."""
    B, C, H, W = input1.shape
    kr = (kernel_size - 1) // 2
    border = max_displacement + kr
    Hp, Wp = H + 2 * pad_size, W + 2 * pad_size
    top_h = int(math.ceil((Hp - 2 * border) / stride1))
    top_w = int(math.ceil((Wp - 2 * border) / stride1))
    ngr = max_displacement // stride2
    ngw = 2 * ngr + 1
    sumelems = kernel_size * kernel_size * C

    pad = ((0, 0), (pad_size, pad_size), (pad_size, pad_size), (0, 0))
    p1 = jnp.pad(jnp.transpose(input1, (0, 2, 3, 1)), pad)
    p2 = jnp.pad(jnp.transpose(input2, (0, 2, 3, 1)), pad)

    outs = []
    for dy in range(ngw):
        for dx in range(ngw):
            s2p = (dy - ngr) * stride2
            s2o = (dx - ngr) * stride2
            acc = jnp.zeros((B, top_h, top_w), jnp.float32)
            for j in range(kernel_size):
                for i in range(kernel_size):
                    y1 = max_displacement + j
                    x1 = max_displacement + i
                    a = p1[:, y1:y1 + top_h * stride1:stride1,
                           x1:x1 + top_w * stride1:stride1, :]
                    b = p2[:, y1 + s2p:y1 + s2p + top_h * stride1:stride1,
                           x1 + s2o:x1 + s2o + top_w * stride1:stride1, :]
                    acc = acc + jnp.sum(a * b, axis=-1)
            outs.append(acc / float(sumelems))
    return jnp.stack(outs, axis=1).astype(input1.dtype)


if __name__ == "__main__":
    key = jax.random.PRNGKey(0)
    k1, k2 = jax.random.split(key)
    B, C, H, W = 2, 4, 16, 16
    x1 = jax.random.normal(k1, (B, C, H, W), dtype=jnp.float32)
    x2 = jax.random.normal(k2, (B, C, H, W), dtype=jnp.float32)

    configs = [
        # FlowNet2-style (kernel_size=1), scaled down
        dict(pad_size=4, kernel_size=1, max_displacement=4,
             stride1=1, stride2=2, corr_multiply=1),
        # 3x3 kernel patch variant to exercise the patch (box-sum) path
        dict(pad_size=5, kernel_size=3, max_displacement=4,
             stride1=1, stride2=2, corr_multiply=1),
    ]

    for cfg in configs:
        mod = Correlation(**cfg)
        out = jax.block_until_ready(mod(x1, x2))
        ref = jax.block_until_ready(correlation_reference(x1, x2, **cfg))
        assert out.shape == ref.shape, (out.shape, ref.shape)
        np.testing.assert_allclose(np.asarray(out), np.asarray(ref),
                                   rtol=1e-5, atol=1e-5)

    print("KERNEL_OK")
</pallas_src>

<mosaic_0001>
module attributes {stable_mosaic.version = 11 : i64} {
  func.func @_corr_kernel(%arg0: i32, %arg1: memref<1x4x16x16xf32, #tpu.memory_space<vmem>>, %arg2: memref<1x4x16x16xf32, #tpu.memory_space<vmem>>, %arg3: memref<1x25x16x16xf32, #tpu.memory_space<vmem>>, %arg4: memref<4x24x32xf32, #tpu.memory_space<vmem>>, %arg5: memref<4x24x24xf32, #tpu.memory_space<vmem>>) attributes {dimension_semantics = [#tpu.dimension_semantics<parallel>], iteration_bounds = array<i64: 2>, scalar_prefetch = 0 : i64, scratch_operands = 2 : i64, tpu.core_type = #tpu.core_type<tc>, window_params = [{transform_indices = @transform_0, window_bounds = array<i64: 1, 4, 16, 16>}, {transform_indices = @transform_1, window_bounds = array<i64: 1, 4, 16, 16>}, {transform_indices = @transform_2, window_bounds = array<i64: 1, 25, 16, 16>}]} {
    %cst = arith.constant 0.000000e+00 : f32
    %0 = vector.broadcast %cst : f32 to vector<4x24x32xf32>
    %c0 = arith.constant 0 : index
    %c0_0 = arith.constant 0 : index
    %c0_1 = arith.constant 0 : index
    %1 = vector.load %arg4[%c0, %c0_0, %c0_1] : memref<4x24x32xf32, #tpu.memory_space<vmem>>, vector<4x24x32xf32>
    tpu.vector_store %arg4[%c0, %c0_0, %c0_1], %0 {strides = array<i32>} : memref<4x24x32xf32, #tpu.memory_space<vmem>>, vector<4x24x32xf32>,
    %cst_2 = arith.constant 0.000000e+00 : f32
    %2 = vector.broadcast %cst_2 : f32 to vector<4x24x24xf32>
    %c0_3 = arith.constant 0 : index
    %c0_4 = arith.constant 0 : index
    %c0_5 = arith.constant 0 : index
    %3 = vector.load %arg5[%c0_3, %c0_4, %c0_5] : memref<4x24x24xf32, #tpu.memory_space<vmem>>, vector<4x24x24xf32>
    tpu.vector_store %arg5[%c0_3, %c0_4, %c0_5], %2 {strides = array<i32>} : memref<4x24x24xf32, #tpu.memory_space<vmem>>, vector<4x24x24xf32>,
    %c0_6 = arith.constant 0 : index
    %c0_7 = arith.constant 0 : index
    %c0_8 = arith.constant 0 : index
    %c0_9 = arith.constant 0 : index
    %4 = vector.load %arg1[%c0_6, %c0_7, %c0_8, %c0_9] : memref<1x4x16x16xf32, #tpu.memory_space<vmem>>, vector<1x4x16x16xf32>
    %5 = vector.shape_cast %4 : vector<1x4x16x16xf32> to vector<4x16x16xf32>
    %cst_10 = arith.constant 2.500000e-01 : f32
    %6 = vector.broadcast %cst_10 : f32 to vector<4x16x16xf32>
    %7 = arith.mulf %5, %6 : vector<4x16x16xf32>
    %c0_11 = arith.constant 0 : index
    %c4 = arith.constant 4 : index
    %c8 = arith.constant 8 : index
    %8 = vector.load %arg4[%c0_11, %c4, %c8] : memref<4x24x32xf32, #tpu.memory_space<vmem>>, vector<4x16x16xf32>
    tpu.vector_store %arg4[%c0_11, %c4, %c8], %7 {strides = array<i32>} : memref<4x24x32xf32, #tpu.memory_space<vmem>>, vector<4x16x16xf32>,
    %c0_12 = arith.constant 0 : index
    %c0_13 = arith.constant 0 : index
    %c0_14 = arith.constant 0 : index
    %c0_15 = arith.constant 0 : index
    %9 = vector.load %arg2[%c0_12, %c0_13, %c0_14, %c0_15] : memref<1x4x16x16xf32, #tpu.memory_space<vmem>>, vector<1x4x16x16xf32>
    %10 = vector.shape_cast %9 : vector<1x4x16x16xf32> to vector<4x16x16xf32>
    %c0_16 = arith.constant 0 : index
    %c4_17 = arith.constant 4 : index
    %c4_18 = arith.constant 4 : index
    %11 = vector.load %arg5[%c0_16, %c4_17, %c4_18] : memref<4x24x24xf32, #tpu.memory_space<vmem>>, vector<4x16x16xf32>
    tpu.vector_store %arg5[%c0_16, %c4_17, %c4_18], %10 {strides = array<i32>} : memref<4x24x24xf32, #tpu.memory_space<vmem>>, vector<4x16x16xf32>,
    %c0_19 = arith.constant 0 : index
    %c4_20 = arith.constant 4 : index
    %c8_21 = arith.constant 8 : index
    %12 = vector.load %arg4[%c0_19, %c4_20, %c8_21] : memref<4x24x32xf32, #tpu.memory_space<vmem>>, vector<4x16x24xf32>
    %c0_22 = arith.constant 0 : index
    %c0_23 = arith.constant 0 : index
    %c0_24 = arith.constant 0 : index
    %13 = vector.load %arg5[%c0_22, %c0_23, %c0_24] : memref<4x24x24xf32, #tpu.memory_space<vmem>>, vector<4x16x24xf32>
    %14 = arith.mulf %12, %13 : vector<4x16x24xf32>
    %cst_25 = arith.constant dense<0.000000e+00> : vector<16x24xf32>
    %15 = vector.multi_reduction <add>, %14, %cst_25 [0] : vector<4x16x24xf32> to vector<16x24xf32>
    %16 = vector.extract_strided_slice %15 {offsets = [0, 0], sizes = [16, 16], strides = [1, 1]} : vector<16x24xf32> to vector<16x16xf32>
    %c0_26 = arith.constant 0 : index
    %c0_27 = arith.constant 0 : index
    %c0_28 = arith.constant 0 : index
    %c0_29 = arith.constant 0 : index
    %17 = vector.load %arg3[%c0_26, %c0_27, %c0_28, %c0_29] : memref<1x25x16x16xf32, #tpu.memory_space<vmem>>, vector<1x1x16x16xf32>
    %18 = vector.shape_cast %17 : vector<1x1x16x16xf32> to vector<16x16xf32>
    %19 = vector.shape_cast %16 : vector<16x16xf32> to vector<1x1x16x16xf32>
    tpu.vector_store %arg3[%c0_26, %c0_27, %c0_28, %c0_29], %19 {strides = array<i32>} : memref<1x25x16x16xf32, #tpu.memory_space<vmem>>, vector<1x1x16x16xf32>,
    %c0_30 = arith.constant 0 : index
    %c2 = arith.constant 2 : index
    %c0_31 = arith.constant 0 : index
    %20 = vector.load %arg5[%c0_30, %c2, %c0_31] : memref<4x24x24xf32, #tpu.memory_space<vmem>>, vector<4x16x24xf32>
    %21 = arith.mulf %12, %20 : vector<4x16x24xf32>
    %cst_32 = arith.constant dense<0.000000e+00> : vector<16x24xf32>
    %22 = vector.multi_reduction <add>, %21, %cst_32 [0] : vector<4x16x24xf32> to vector<16x24xf32>
    %23 = vector.extract_strided_slice %22 {offsets = [0, 0], sizes = [16, 16], strides = [1, 1]} : vector<16x24xf32> to vector<16x16xf32>
    %c0_33 = arith.constant 0 : index
    %c5 = arith.constant 5 : index
    %c0_34 = arith.constant 0 : index
    %c0_35 = arith.constant 0 : index
    %24 = vector.load %arg3[%c0_33, %c5, %c0_34, %c0_35] : memref<1x25x16x16xf32, #tpu.memory_space<vmem>>, vector<1x1x16x16xf32>
    %25 = vector.shape_cast %24 : vector<1x1x16x16xf32> to vector<16x16xf32>
    %26 = vector.shape_cast %23 : vector<16x16xf32> to vector<1x1x16x16xf32>
    tpu.vector_store %arg3[%c0_33, %c5, %c0_34, %c0_35], %26 {strides = array<i32>} : memref<1x25x16x16xf32, #tpu.memory_space<vmem>>, vector<1x1x16x16xf32>,
    %c0_36 = arith.constant 0 : index
    %c4_37 = arith.constant 4 : index
    %c0_38 = arith.constant 0 : index
    %27 = vector.load %arg5[%c0_36, %c4_37, %c0_38] : memref<4x24x24xf32, #tpu.memory_space<vmem>>, vector<4x16x24xf32>
    %28 = arith.mulf %12, %27 : vector<4x16x24xf32>
    %cst_39 = arith.constant dense<0.000000e+00> : vector<16x24xf32>
    %29 = vector.multi_reduction <add>, %28, %cst_39 [0] : vector<4x16x24xf32> to vector<16x24xf32>
    %30 = vector.extract_strided_slice %29 {offsets = [0, 0], sizes = [16, 16], strides = [1, 1]} : vector<16x24xf32> to vector<16x16xf32>
    %c0_40 = arith.constant 0 : index
    %c10 = arith.constant 10 : index
    %c0_41 = arith.constant 0 : index
    %c0_42 = arith.constant 0 : index
    %31 = vector.load %arg3[%c0_40, %c10, %c0_41, %c0_42] : memref<1x25x16x16xf32, #tpu.memory_space<vmem>>, vector<1x1x16x16xf32>
    %32 = vector.shape_cast %31 : vector<1x1x16x16xf32> to vector<16x16xf32>
    %33 = vector.shape_cast %30 : vector<16x16xf32> to vector<1x1x16x16xf32>
    tpu.vector_store %arg3[%c0_40, %c10, %c0_41, %c0_42], %33 {strides = array<i32>} : memref<1x25x16x16xf32, #tpu.memory_space<vmem>>, vector<1x1x16x16xf32>,
    %c0_43 = arith.constant 0 : index
    %c6 = arith.constant 6 : index
    %c0_44 = arith.constant 0 : index
    %34 = vector.load %arg5[%c0_43, %c6, %c0_44] : memref<4x24x24xf32, #tpu.memory_space<vmem>>, vector<4x16x24xf32>
    %35 = arith.mulf %12, %34 : vector<4x16x24xf32>
    %cst_45 = arith.constant dense<0.000000e+00> : vector<16x24xf32>
    %36 = vector.multi_reduction <add>, %35, %cst_45 [0] : vector<4x16x24xf32> to vector<16x24xf32>
    %37 = vector.extract_strided_slice %36 {offsets = [0, 0], sizes = [16, 16], strides = [1, 1]} : vector<16x24xf32> to vector<16x16xf32>
    %c0_46 = arith.constant 0 : index
    %c15 = arith.constant 15 : index
    %c0_47 = arith.constant 0 : index
    %c0_48 = arith.constant 0 : index
    %38 = vector.load %arg3[%c0_46, %c15, %c0_47, %c0_48] : memref<1x25x16x16xf32, #tpu.memory_space<vmem>>, vector<1x1x16x16xf32>
    %39 = vector.shape_cast %38 : vector<1x1x16x16xf32> to vector<16x16xf32>
    %40 = vector.shape_cast %37 : vector<16x16xf32> to vector<1x1x16x16xf32>
    tpu.vector_store %arg3[%c0_46, %c15, %c0_47, %c0_48], %40 {strides = array<i32>} : memref<1x25x16x16xf32, #tpu.memory_space<vmem>>, vector<1x1x16x16xf32>,
    %c0_49 = arith.constant 0 : index
    %c8_50 = arith.constant 8 : index
    %c0_51 = arith.constant 0 : index
    %41 = vector.load %arg5[%c0_49, %c8_50, %c0_51] : memref<4x24x24xf32, #tpu.memory_space<vmem>>, vector<4x16x24xf32>
    %42 = arith.mulf %12, %41 : vector<4x16x24xf32>
    %cst_52 = arith.constant dense<0.000000e+00> : vector<16x24xf32>
    %43 = vector.multi_reduction <add>, %42, %cst_52 [0] : vector<4x16x24xf32> to vector<16x24xf32>
    %44 = vector.extract_strided_slice %43 {offsets = [0, 0], sizes = [16, 16], strides = [1, 1]} : vector<16x24xf32> to vector<16x16xf32>
    %c0_53 = arith.constant 0 : index
    %c20 = arith.constant 20 : index
    %c0_54 = arith.constant 0 : index
    %c0_55 = arith.constant 0 : index
    %45 = vector.load %arg3[%c0_53, %c20, %c0_54, %c0_55] : memref<1x25x16x16xf32, #tpu.memory_space<vmem>>, vector<1x1x16x16xf32>
    %46 = vector.shape_cast %45 : vector<1x1x16x16xf32> to vector<16x16xf32>
    %47 = vector.shape_cast %44 : vector<16x16xf32> to vector<1x1x16x16xf32>
    tpu.vector_store %arg3[%c0_53, %c20, %c0_54, %c0_55], %47 {strides = array<i32>} : memref<1x25x16x16xf32, #tpu.memory_space<vmem>>, vector<1x1x16x16xf32>,
    %c0_56 = arith.constant 0 : index
    %c4_57 = arith.constant 4 : index
    %c6_58 = arith.constant 6 : index
    %48 = vector.load %arg4[%c0_56, %c4_57, %c6_58] : memref<4x24x32xf32, #tpu.memory_space<vmem>>, vector<4x16x24xf32>
    %c0_59 = arith.constant 0 : index
    %c0_60 = arith.constant 0 : index
    %c0_61 = arith.constant 0 : index
    %49 = vector.load %arg5[%c0_59, %c0_60, %c0_61] : memref<4x24x24xf32, #tpu.memory_space<vmem>>, vector<4x16x24xf32>
    %50 = arith.mulf %48, %49 : vector<4x16x24xf32>
    %cst_62 = arith.constant dense<0.000000e+00> : vector<16x24xf32>
    %51 = vector.multi_reduction <add>, %50, %cst_62 [0] : vector<4x16x24xf32> to vector<16x24xf32>
    %52 = vector.extract_strided_slice %51 {offsets = [0, 2], sizes = [16, 16], strides = [1, 1]} : vector<16x24xf32> to vector<16x16xf32>
    %c0_63 = arith.constant 0 : index
    %c1 = arith.constant 1 : index
    %c0_64 = arith.constant 0 : index
    %c0_65 = arith.constant 0 : index
    %53 = vector.load %arg3[%c0_63, %c1, %c0_64, %c0_65] : memref<1x25x16x16xf32, #tpu.memory_space<vmem>>, vector<1x1x16x16xf32>
    %54 = vector.shape_cast %53 : vector<1x1x16x16xf32> to vector<16x16xf32>
    %55 = vector.shape_cast %52 : vector<16x16xf32> to vector<1x1x16x16xf32>
    tpu.vector_store %arg3[%c0_63, %c1, %c0_64, %c0_65], %55 {strides = array<i32>} : memref<1x25x16x16xf32, #tpu.memory_space<vmem>>, vector<1x1x16x16xf32>,
    %c0_66 = arith.constant 0 : index
    %c2_67 = arith.constant 2 : index
    %c0_68 = arith.constant 0 : index
    %56 = vector.load %arg5[%c0_66, %c2_67, %c0_68] : memref<4x24x24xf32, #tpu.memory_space<vmem>>, vector<4x16x24xf32>
    %57 = arith.mulf %48, %56 : vector<4x16x24xf32>
    %cst_69 = arith.constant dense<0.000000e+00> : vector<16x24xf32>
    %58 = vector.multi_reduction <add>, %57, %cst_69 [0] : vector<4x16x24xf32> to vector<16x24xf32>
    %59 = vector.extract_strided_slice %58 {offsets = [0, 2], sizes = [16, 16], strides = [1, 1]} : vector<16x24xf32> to vector<16x16xf32>
    %c0_70 = arith.constant 0 : index
    %c6_71 = arith.constant 6 : index
    %c0_72 = arith.constant 0 : index
    %c0_73 = arith.constant 0 : index
    %60 = vector.load %arg3[%c0_70, %c6_71, %c0_72, %c0_73] : memref<1x25x16x16xf32, #tpu.memory_space<vmem>>, vector<1x1x16x16xf32>
    %61 = vector.shape_cast %60 : vector<1x1x16x16xf32> to vector<16x16xf32>
    %62 = vector.shape_cast %59 : vector<16x16xf32> to vector<1x1x16x16xf32>
    tpu.vector_store %arg3[%c0_70, %c6_71, %c0_72, %c0_73], %62 {strides = array<i32>} : memref<1x25x16x16xf32, #tpu.memory_space<vmem>>, vector<1x1x16x16xf32>,
    %c0_74 = arith.constant 0 : index
    %c4_75 = arith.constant 4 : index
    %c0_76 = arith.constant 0 : index
    %63 = vector.load %arg5[%c0_74, %c4_75, %c0_76] : memref<4x24x24xf32, #tpu.memory_space<vmem>>, vector<4x16x24xf32>
    %64 = arith.mulf %48, %63 : vector<4x16x24xf32>
    %cst_77 = arith.constant dense<0.000000e+00> : vector<16x24xf32>
    %65 = vector.multi_reduction <add>, %64, %cst_77 [0] : vector<4x16x24xf32> to vector<16x24xf32>
    %66 = vector.extract_strided_slice %65 {offsets = [0, 2], sizes = [16, 16], strides = [1, 1]} : vector<16x24xf32> to vector<16x16xf32>
    %c0_78 = arith.constant 0 : index
    %c11 = arith.constant 11 : index
    %c0_79 = arith.constant 0 : index
    %c0_80 = arith.constant 0 : index
    %67 = vector.load %arg3[%c0_78, %c11, %c0_79, %c0_80] : memref<1x25x16x16xf32, #tpu.memory_space<vmem>>, vector<1x1x16x16xf32>
    %68 = vector.shape_cast %67 : vector<1x1x16x16xf32> to vector<16x16xf32>
    %69 = vector.shape_cast %66 : vector<16x16xf32> to vector<1x1x16x16xf32>
    tpu.vector_store %arg3[%c0_78, %c11, %c0_79, %c0_80], %69 {strides = array<i32>} : memref<1x25x16x16xf32, #tpu.memory_space<vmem>>, vector<1x1x16x16xf32>,
    %c0_81 = arith.constant 0 : index
    %c6_82 = arith.constant 6 : index
    %c0_83 = arith.constant 0 : index
    %70 = vector.load %arg5[%c0_81, %c6_82, %c0_83] : memref<4x24x24xf32, #tpu.memory_space<vmem>>, vector<4x16x24xf32>
    %71 = arith.mulf %48, %70 : vector<4x16x24xf32>
    %cst_84 = arith.constant dense<0.000000e+00> : vector<16x24xf32>
    %72 = vector.multi_reduction <add>, %71, %cst_84 [0] : vector<4x16x24xf32> to vector<16x24xf32>
    %73 = vector.extract_strided_slice %72 {offsets = [0, 2], sizes = [16, 16], strides = [1, 1]} : vector<16x24xf32> to vector<16x16xf32>
    %c0_85 = arith.constant 0 : index
    %c16 = arith.constant 16 : index
    %c0_86 = arith.constant 0 : index
    %c0_87 = arith.constant 0 : index
    %74 = vector.load %arg3[%c0_85, %c16, %c0_86, %c0_87] : memref<1x25x16x16xf32, #tpu.memory_space<vmem>>, vector<1x1x16x16xf32>
    %75 = vector.shape_cast %74 : vector<1x1x16x16xf32> to vector<16x16xf32>
    %76 = vector.shape_cast %73 : vector<16x16xf32> to vector<1x1x16x16xf32>
    tpu.vector_store %arg3[%c0_85, %c16, %c0_86, %c0_87], %76 {strides = array<i32>} : memref<1x25x16x16xf32, #tpu.memory_space<vmem>>, vector<1x1x16x16xf32>,
    %c0_88 = arith.constant 0 : index
    %c8_89 = arith.constant 8 : index
    %c0_90 = arith.constant 0 : index
    %77 = vector.load %arg5[%c0_88, %c8_89, %c0_90] : memref<4x24x24xf32, #tpu.memory_space<vmem>>, vector<4x16x24xf32>
    %78 = arith.mulf %48, %77 : vector<4x16x24xf32>
    %cst_91 = arith.constant dense<0.000000e+00> : vector<16x24xf32>
    %79 = vector.multi_reduction <add>, %78, %cst_91 [0] : vector<4x16x24xf32> to vector<16x24xf32>
    %80 = vector.extract_strided_slice %79 {offsets = [0, 2], sizes = [16, 16], strides = [1, 1]} : vector<16x24xf32> to vector<16x16xf32>
    %c0_92 = arith.constant 0 : index
    %c21 = arith.constant 21 : index
    %c0_93 = arith.constant 0 : index
    %c0_94 = arith.constant 0 : index
    %81 = vector.load %arg3[%c0_92, %c21, %c0_93, %c0_94] : memref<1x25x16x16xf32, #tpu.memory_space<vmem>>, vector<1x1x16x16xf32>
    %82 = vector.shape_cast %81 : vector<1x1x16x16xf32> to vector<16x16xf32>
    %83 = vector.shape_cast %80 : vector<16x16xf32> to vector<1x1x16x16xf32>
    tpu.vector_store %arg3[%c0_92, %c21, %c0_93, %c0_94], %83 {strides = array<i32>} : memref<1x25x16x16xf32, #tpu.memory_space<vmem>>, vector<1x1x16x16xf32>,
    %c0_95 = arith.constant 0 : index
    %c4_96 = arith.constant 4 : index
    %c4_97 = arith.constant 4 : index
    %84 = vector.load %arg4[%c0_95, %c4_96, %c4_97] : memref<4x24x32xf32, #tpu.memory_space<vmem>>, vector<4x16x24xf32>
    %c0_98 = arith.constant 0 : index
    %c0_99 = arith.constant 0 : index
    %c0_100 = arith.constant 0 : index
    %85 = vector.load %arg5[%c0_98, %c0_99, %c0_100] : memref<4x24x24xf32, #tpu.memory_space<vmem>>, vector<4x16x24xf32>
    %86 = arith.mulf %84, %85 : vector<4x16x24xf32>
    %cst_101 = arith.constant dense<0.000000e+00> : vector<16x24xf32>
    %87 = vector.multi_reduction <add>, %86, %cst_101 [0] : vector<4x16x24xf32> to vector<16x24xf32>
    %88 = vector.extract_strided_slice %87 {offsets = [0, 4], sizes = [16, 16], strides = [1, 1]} : vector<16x24xf32> to vector<16x16xf32>
    %c0_102 = arith.constant 0 : index
    %c2_103 = arith.constant 2 : index
    %c0_104 = arith.constant 0 : index
    %c0_105 = arith.constant 0 : index
    %89 = vector.load %arg3[%c0_102, %c2_103, %c0_104, %c0_105] : memref<1x25x16x16xf32, #tpu.memory_space<vmem>>, vector<1x1x16x16xf32>
    %90 = vector.shape_cast %89 : vector<1x1x16x16xf32> to vector<16x16xf32>
    %91 = vector.shape_cast %88 : vector<16x16xf32> to vector<1x1x16x16xf32>
    tpu.vector_store %arg3[%c0_102, %c2_103, %c0_104, %c0_105], %91 {strides = array<i32>} : memref<1x25x16x16xf32, #tpu.memory_space<vmem>>, vector<1x1x16x16xf32>,
    %c0_106 = arith.constant 0 : index
    %c2_107 = arith.constant 2 : index
    %c0_108 = arith.constant 0 : index
    %92 = vector.load %arg5[%c0_106, %c2_107, %c0_108] : memref<4x24x24xf32, #tpu.memory_space<vmem>>, vector<4x16x24xf32>
    %93 = arith.mulf %84, %92 : vector<4x16x24xf32>
    %cst_109 = arith.constant dense<0.000000e+00> : vector<16x24xf32>
    %94 = vector.multi_reduction <add>, %93, %cst_109 [0] : vector<4x16x24xf32> to vector<16x24xf32>
    %95 = vector.extract_strided_slice %94 {offsets = [0, 4], sizes = [16, 16], strides = [1, 1]} : vector<16x24xf32> to vector<16x16xf32>
    %c0_110 = arith.constant 0 : index
    %c7 = arith.constant 7 : index
    %c0_111 = arith.constant 0 : index
    %c0_112 = arith.constant 0 : index
    %96 = vector.load %arg3[%c0_110, %c7, %c0_111, %c0_112] : memref<1x25x16x16xf32, #tpu.memory_space<vmem>>, vector<1x1x16x16xf32>
    %97 = vector.shape_cast %96 : vector<1x1x16x16xf32> to vector<16x16xf32>
    %98 = vector.shape_cast %95 : vector<16x16xf32> to vector<1x1x16x16xf32>
    tpu.vector_store %arg3[%c0_110, %c7, %c0_111, %c0_112], %98 {strides = array<i32>} : memref<1x25x16x16xf32, #tpu.memory_space<vmem>>, vector<1x1x16x16xf32>,
    %c0_113 = arith.constant 0 : index
    %c4_114 = arith.constant 4 : index
    %c0_115 = arith.constant 0 : index
    %99 = vector.load %arg5[%c0_113, %c4_114, %c0_115] : memref<4x24x24xf32, #tpu.memory_space<vmem>>, vector<4x16x24xf32>
    %100 = arith.mulf %84, %99 : vector<4x16x24xf32>
    %cst_116 = arith.constant dense<0.000000e+00> : vector<16x24xf32>
    %101 = vector.multi_reduction <add>, %100, %cst_116 [0] : vector<4x16x24xf32> to vector<16x24xf32>
    %102 = vector.extract_strided_slice %101 {offsets = [0, 4], sizes = [16, 16], strides = [1, 1]} : vector<16x24xf32> to vector<16x16xf32>
    %c0_117 = arith.constant 0 : index
    %c12 = arith.constant 12 : index
    %c0_118 = arith.constant 0 : index
    %c0_119 = arith.constant 0 : index
    %103 = vector.load %arg3[%c0_117, %c12, %c0_118, %c0_119] : memref<1x25x16x16xf32, #tpu.memory_space<vmem>>, vector<1x1x16x16xf32>
    %104 = vector.shape_cast %103 : vector<1x1x16x16xf32> to vector<16x16xf32>
    %105 = vector.shape_cast %102 : vector<16x16xf32> to vector<1x1x16x16xf32>
    tpu.vector_store %arg3[%c0_117, %c12, %c0_118, %c0_119], %105 {strides = array<i32>} : memref<1x25x16x16xf32, #tpu.memory_space<vmem>>, vector<1x1x16x16xf32>,
    %c0_120 = arith.constant 0 : index
    %c6_121 = arith.constant 6 : index
    %c0_122 = arith.constant 0 : index
    %106 = vector.load %arg5[%c0_120, %c6_121, %c0_122] : memref<4x24x24xf32, #tpu.memory_space<vmem>>, vector<4x16x24xf32>
    %107 = arith.mulf %84, %106 : vector<4x16x24xf32>
    %cst_123 = arith.constant dense<0.000000e+00> : vector<16x24xf32>
    %108 = vector.multi_reduction <add>, %107, %cst_123 [0] : vector<4x16x24xf32> to vector<16x24xf32>
    %109 = vector.extract_strided_slice %108 {offsets = [0, 4], sizes = [16, 16], strides = [1, 1]} : vector<16x24xf32> to vector<16x16xf32>
    %c0_124 = arith.constant 0 : index
    %c17 = arith.constant 17 : index
    %c0_125 = arith.constant 0 : index
    %c0_126 = arith.constant 0 : index
    %110 = vector.load %arg3[%c0_124, %c17, %c0_125, %c0_126] : memref<1x25x16x16xf32, #tpu.memory_space<vmem>>, vector<1x1x16x16xf32>
    %111 = vector.shape_cast %110 : vector<1x1x16x16xf32> to vector<16x16xf32>
    %112 = vector.shape_cast %109 : vector<16x16xf32> to vector<1x1x16x16xf32>
    tpu.vector_store %arg3[%c0_124, %c17, %c0_125, %c0_126], %112 {strides = array<i32>} : memref<1x25x16x16xf32, #tpu.memory_space<vmem>>, vector<1x1x16x16xf32>,
    %c0_127 = arith.constant 0 : index
    %c8_128 = arith.constant 8 : index
    %c0_129 = arith.constant 0 : index
    %113 = vector.load %arg5[%c0_127, %c8_128, %c0_129] : memref<4x24x24xf32, #tpu.memory_space<vmem>>, vector<4x16x24xf32>
    %114 = arith.mulf %84, %113 : vector<4x16x24xf32>
    %cst_130 = arith.constant dense<0.000000e+00> : vector<16x24xf32>
    %115 = vector.multi_reduction <add>, %114, %cst_130 [0] : vector<4x16x24xf32> to vector<16x24xf32>
    %116 = vector.extract_strided_slice %115 {offsets = [0, 4], sizes = [16, 16], strides = [1, 1]} : vector<16x24xf32> to vector<16x16xf32>
    %c0_131 = arith.constant 0 : index
    %c22 = arith.constant 22 : index
    %c0_132 = arith.constant 0 : index
    %c0_133 = arith.constant 0 : index
    %117 = vector.load %arg3[%c0_131, %c22, %c0_132, %c0_133] : memref<1x25x16x16xf32, #tpu.memory_space<vmem>>, vector<1x1x16x16xf32>
    %118 = vector.shape_cast %117 : vector<1x1x16x16xf32> to vector<16x16xf32>
    %119 = vector.shape_cast %116 : vector<16x16xf32> to vector<1x1x16x16xf32>
    tpu.vector_store %arg3[%c0_131, %c22, %c0_132, %c0_133], %119 {strides = array<i32>} : memref<1x25x16x16xf32, #tpu.memory_space<vmem>>, vector<1x1x16x16xf32>,
    %c0_134 = arith.constant 0 : index
    %c4_135 = arith.constant 4 : index
    %c2_136 = arith.constant 2 : index
    %120 = vector.load %arg4[%c0_134, %c4_135, %c2_136] : memref<4x24x32xf32, #tpu.memory_space<vmem>>, vector<4x16x24xf32>
    %c0_137 = arith.constant 0 : index
    %c0_138 = arith.constant 0 : index
    %c0_139 = arith.constant 0 : index
    %121 = vector.load %arg5[%c0_137, %c0_138, %c0_139] : memref<4x24x24xf32, #tpu.memory_space<vmem>>, vector<4x16x24xf32>
    %122 = arith.mulf %120, %121 : vector<4x16x24xf32>
    %cst_140 = arith.constant dense<0.000000e+00> : vector<16x24xf32>
    %123 = vector.multi_reduction <add>, %122, %cst_140 [0] : vector<4x16x24xf32> to vector<16x24xf32>
    %124 = vector.extract_strided_slice %123 {offsets = [0, 6], sizes = [16, 16], strides = [1, 1]} : vector<16x24xf32> to vector<16x16xf32>
    %c0_141 = arith.constant 0 : index
    %c3 = arith.constant 3 : index
    %c0_142 = arith.constant 0 : index
    %c0_143 = arith.constant 0 : index
    %125 = vector.load %arg3[%c0_141, %c3, %c0_142, %c0_143] : memref<1x25x16x16xf32, #tpu.memory_space<vmem>>, vector<1x1x16x16xf32>
    %126 = vector.shape_cast %125 : vector<1x1x16x16xf32> to vector<16x16xf32>
    %127 = vector.shape_cast %124 : vector<16x16xf32> to vector<1x1x16x16xf32>
    tpu.vector_store %arg3[%c0_141, %c3, %c0_142, %c0_143], %127 {strides = array<i32>} : memref<1x25x16x16xf32, #tpu.memory_space<vmem>>, vector<1x1x16x16xf32>,
    %c0_144 = arith.constant 0 : index
    %c2_145 = arith.constant 2 : index
    %c0_146 = arith.constant 0 : index
    %128 = vector.load %arg5[%c0_144, %c2_145, %c0_146] : memref<4x24x24xf32, #tpu.memory_space<vmem>>, vector<4x16x24xf32>
    %129 = arith.mulf %120, %128 : vector<4x16x24xf32>
    %cst_147 = arith.constant dense<0.000000e+00> : vector<16x24xf32>
    %130 = vector.multi_reduction <add>, %129, %cst_147 [0] : vector<4x16x24xf32> to vector<16x24xf32>
    %131 = vector.extract_strided_slice %130 {offsets = [0, 6], sizes = [16, 16], strides = [1, 1]} : vector<16x24xf32> to vector<16x16xf32>
    %c0_148 = arith.constant 0 : index
    %c8_149 = arith.constant 8 : index
    %c0_150 = arith.constant 0 : index
    %c0_151 = arith.constant 0 : index
    %132 = vector.load %arg3[%c0_148, %c8_149, %c0_150, %c0_151] : memref<1x25x16x16xf32, #tpu.memory_space<vmem>>, vector<1x1x16x16xf32>
    %133 = vector.shape_cast %132 : vector<1x1x16x16xf32> to vector<16x16xf32>
    %134 = vector.shape_cast %131 : vector<16x16xf32> to vector<1x1x16x16xf32>
    tpu.vector_store %arg3[%c0_148, %c8_149, %c0_150, %c0_151], %134 {strides = array<i32>} : memref<1x25x16x16xf32, #tpu.memory_space<vmem>>, vector<1x1x16x16xf32>,
    %c0_152 = arith.constant 0 : index
    %c4_153 = arith.constant 4 : index
    %c0_154 = arith.constant 0 : index
    %135 = vector.load %arg5[%c0_152, %c4_153, %c0_154] : memref<4x24x24xf32, #tpu.memory_space<vmem>>, vector<4x16x24xf32>
    %136 = arith.mulf %120, %135 : vector<4x16x24xf32>
    %cst_155 = arith.constant dense<0.000000e+00> : vector<16x24xf32>
    %137 = vector.multi_reduction <add>, %136, %cst_155 [0] : vector<4x16x24xf32> to vector<16x24xf32>
    %138 = vector.extract_strided_slice %137 {offsets = [0, 6], sizes = [16, 16], strides = [1, 1]} : vector<16x24xf32> to vector<16x16xf32>
    %c0_156 = arith.constant 0 : index
    %c13 = arith.constant 13 : index
    %c0_157 = arith.constant 0 : index
    %c0_158 = arith.constant 0 : index
    %139 = vector.load %arg3[%c0_156, %c13, %c0_157, %c0_158] : memref<1x25x16x16xf32, #tpu.memory_space<vmem>>, vector<1x1x16x16xf32>
    %140 = vector.shape_cast %139 : vector<1x1x16x16xf32> to vector<16x16xf32>
    %141 = vector.shape_cast %138 : vector<16x16xf32> to vector<1x1x16x16xf32>
    tpu.vector_store %arg3[%c0_156, %c13, %c0_157, %c0_158], %141 {strides = array<i32>} : memref<1x25x16x16xf32, #tpu.memory_space<vmem>>, vector<1x1x16x16xf32>,
    %c0_159 = arith.constant 0 : index
    %c6_160 = arith.constant 6 : index
    %c0_161 = arith.constant 0 : index
    %142 = vector.load %arg5[%c0_159, %c6_160, %c0_161] : memref<4x24x24xf32, #tpu.memory_space<vmem>>, vector<4x16x24xf32>
    %143 = arith.mulf %120, %142 : vector<4x16x24xf32>
    %cst_162 = arith.constant dense<0.000000e+00> : vector<16x24xf32>
    %144 = vector.multi_reduction <add>, %143, %cst_162 [0] : vector<4x16x24xf32> to vector<16x24xf32>
    %145 = vector.extract_strided_slice %144 {offsets = [0, 6], sizes = [16, 16], strides = [1, 1]} : vector<16x24xf32> to vector<16x16xf32>
    %c0_163 = arith.constant 0 : index
    %c18 = arith.constant 18 : index
    %c0_164 = arith.constant 0 : index
    %c0_165 = arith.constant 0 : index
    %146 = vector.load %arg3[%c0_163, %c18, %c0_164, %c0_165] : memref<1x25x16x16xf32, #tpu.memory_space<vmem>>, vector<1x1x16x16xf32>
    %147 = vector.shape_cast %146 : vector<1x1x16x16xf32> to vector<16x16xf32>
    %148 = vector.shape_cast %145 : vector<16x16xf32> to vector<1x1x16x16xf32>
    tpu.vector_store %arg3[%c0_163, %c18, %c0_164, %c0_165], %148 {strides = array<i32>} : memref<1x25x16x16xf32, #tpu.memory_space<vmem>>, vector<1x1x16x16xf32>,
    %c0_166 = arith.constant 0 : index
    %c8_167 = arith.constant 8 : index
    %c0_168 = arith.constant 0 : index
    %149 = vector.load %arg5[%c0_166, %c8_167, %c0_168] : memref<4x24x24xf32, #tpu.memory_space<vmem>>, vector<4x16x24xf32>
    %150 = arith.mulf %120, %149 : vector<4x16x24xf32>
    %cst_169 = arith.constant dense<0.000000e+00> : vector<16x24xf32>
    %151 = vector.multi_reduction <add>, %150, %cst_169 [0] : vector<4x16x24xf32> to vector<16x24xf32>
    %152 = vector.extract_strided_slice %151 {offsets = [0, 6], sizes = [16, 16], strides = [1, 1]} : vector<16x24xf32> to vector<16x16xf32>
    %c0_170 = arith.constant 0 : index
    %c23 = arith.constant 23 : index
    %c0_171 = arith.constant 0 : index
    %c0_172 = arith.constant 0 : index
    %153 = vector.load %arg3[%c0_170, %c23, %c0_171, %c0_172] : memref<1x25x16x16xf32, #tpu.memory_space<vmem>>, vector<1x1x16x16xf32>
    %154 = vector.shape_cast %153 : vector<1x1x16x16xf32> to vector<16x16xf32>
    %155 = vector.shape_cast %152 : vector<16x16xf32> to vector<1x1x16x16xf32>
    tpu.vector_store %arg3[%c0_170, %c23, %c0_171, %c0_172], %155 {strides = array<i32>} : memref<1x25x16x16xf32, #tpu.memory_space<vmem>>, vector<1x1x16x16xf32>,
    %c0_173 = arith.constant 0 : index
    %c4_174 = arith.constant 4 : index
    %c0_175 = arith.constant 0 : index
    %156 = vector.load %arg4[%c0_173, %c4_174, %c0_175] : memref<4x24x32xf32, #tpu.memory_space<vmem>>, vector<4x16x24xf32>
    %c0_176 = arith.constant 0 : index
    %c0_177 = arith.constant 0 : index
    %c0_178 = arith.constant 0 : index
    %157 = vector.load %arg5[%c0_176, %c0_177, %c0_178] : memref<4x24x24xf32, #tpu.memory_space<vmem>>, vector<4x16x24xf32>
    %158 = arith.mulf %156, %157 : vector<4x16x24xf32>
    %cst_179 = arith.constant dense<0.000000e+00> : vector<16x24xf32>
    %159 = vector.multi_reduction <add>, %158, %cst_179 [0] : vector<4x16x24xf32> to vector<16x24xf32>
    %160 = vector.extract_strided_slice %159 {offsets = [0, 8], sizes = [16, 16], strides = [1, 1]} : vector<16x24xf32> to vector<16x16xf32>
    %c0_180 = arith.constant 0 : index
    %c4_181 = arith.constant 4 : index
    %c0_182 = arith.constant 0 : index
    %c0_183 = arith.constant 0 : index
    %161 = vector.load %arg3[%c0_180, %c4_181, %c0_182, %c0_183] : memref<1x25x16x16xf32, #tpu.memory_space<vmem>>, vector<1x1x16x16xf32>
    %162 = vector.shape_cast %161 : vector<1x1x16x16xf32> to vector<16x16xf32>
    %163 = vector.shape_cast %160 : vector<16x16xf32> to vector<1x1x16x16xf32>
    tpu.vector_store %arg3[%c0_180, %c4_181, %c0_182, %c0_183], %163 {strides = array<i32>} : memref<1x25x16x16xf32, #tpu.memory_space<vmem>>, vector<1x1x16x16xf32>,
    %c0_184 = arith.constant 0 : index
    %c2_185 = arith.constant 2 : index
    %c0_186 = arith.constant 0 : index
    %164 = vector.load %arg5[%c0_184, %c2_185, %c0_186] : memref<4x24x24xf32, #tpu.memory_space<vmem>>, vector<4x16x24xf32>
    %165 = arith.mulf %156, %164 : vector<4x16x24xf32>
    %cst_187 = arith.constant dense<0.000000e+00> : vector<16x24xf32>
    %166 = vector.multi_reduction <add>, %165, %cst_187 [0] : vector<4x16x24xf32> to vector<16x24xf32>
    %167 = vector.extract_strided_slice %166 {offsets = [0, 8], sizes = [16, 16], strides = [1, 1]} : vector<16x24xf32> to vector<16x16xf32>
    %c0_188 = arith.constant 0 : index
    %c9 = arith.constant 9 : index
    %c0_189 = arith.constant 0 : index
    %c0_190 = arith.constant 0 : index
    %168 = vector.load %arg3[%c0_188, %c9, %c0_189, %c0_190] : memref<1x25x16x16xf32, #tpu.memory_space<vmem>>, vector<1x1x16x16xf32>
    %169 = vector.shape_cast %168 : vector<1x1x16x16xf32> to vector<16x16xf32>
    %170 = vector.shape_cast %167 : vector<16x16xf32> to vector<1x1x16x16xf32>
    tpu.vector_store %arg3[%c0_188, %c9, %c0_189, %c0_190], %170 {strides = array<i32>} : memref<1x25x16x16xf32, #tpu.memory_space<vmem>>, vector<1x1x16x16xf32>,
    %c0_191 = arith.constant 0 : index
    %c4_192 = arith.constant 4 : index
    %c0_193 = arith.constant 0 : index
    %171 = vector.load %arg5[%c0_191, %c4_192, %c0_193] : memref<4x24x24xf32, #tpu.memory_space<vmem>>, vector<4x16x24xf32>
    %172 = arith.mulf %156, %171 : vector<4x16x24xf32>
    %cst_194 = arith.constant dense<0.000000e+00> : vector<16x24xf32>
    %173 = vector.multi_reduction <add>, %172, %cst_194 [0] : vector<4x16x24xf32> to vector<16x24xf32>
    %174 = vector.extract_strided_slice %173 {offsets = [0, 8], sizes = [16, 16], strides = [1, 1]} : vector<16x24xf32> to vector<16x16xf32>
    %c0_195 = arith.constant 0 : index
    %c14 = arith.constant 14 : index
    %c0_196 = arith.constant 0 : index
    %c0_197 = arith.constant 0 : index
    %175 = vector.load %arg3[%c0_195, %c14, %c0_196, %c0_197] : memref<1x25x16x16xf32, #tpu.memory_space<vmem>>, vector<1x1x16x16xf32>
    %176 = vector.shape_cast %175 : vector<1x1x16x16xf32> to vector<16x16xf32>
    %177 = vector.shape_cast %174 : vector<16x16xf32> to vector<1x1x16x16xf32>
    tpu.vector_store %arg3[%c0_195, %c14, %c0_196, %c0_197], %177 {strides = array<i32>} : memref<1x25x16x16xf32, #tpu.memory_space<vmem>>, vector<1x1x16x16xf32>,
    %c0_198 = arith.constant 0 : index
    %c6_199 = arith.constant 6 : index
    %c0_200 = arith.constant 0 : index
    %178 = vector.load %arg5[%c0_198, %c6_199, %c0_200] : memref<4x24x24xf32, #tpu.memory_space<vmem>>, vector<4x16x24xf32>
    %179 = arith.mulf %156, %178 : vector<4x16x24xf32>
    %cst_201 = arith.constant dense<0.000000e+00> : vector<16x24xf32>
    %180 = vector.multi_reduction <add>, %179, %cst_201 [0] : vector<4x16x24xf32> to vector<16x24xf32>
    %181 = vector.extract_strided_slice %180 {offsets = [0, 8], sizes = [16, 16], strides = [1, 1]} : vector<16x24xf32> to vector<16x16xf32>
    %c0_202 = arith.constant 0 : index
    %c19 = arith.constant 19 : index
    %c0_203 = arith.constant 0 : index
    %c0_204 = arith.constant 0 : index
    %182 = vector.load %arg3[%c0_202, %c19, %c0_203, %c0_204] : memref<1x25x16x16xf32, #tpu.memory_space<vmem>>, vector<1x1x16x16xf32>
    %183 = vector.shape_cast %182 : vector<1x1x16x16xf32> to vector<16x16xf32>
    %184 = vector.shape_cast %181 : vector<16x16xf32> to vector<1x1x16x16xf32>
    tpu.vector_store %arg3[%c0_202, %c19, %c0_203, %c0_204], %184 {strides = array<i32>} : memref<1x25x16x16xf32, #tpu.memory_space<vmem>>, vector<1x1x16x16xf32>,
    %c0_205 = arith.constant 0 : index
    %c8_206 = arith.constant 8 : index
    %c0_207 = arith.constant 0 : index
    %185 = vector.load %arg5[%c0_205, %c8_206, %c0_207] : memref<4x24x24xf32, #tpu.memory_space<vmem>>, vector<4x16x24xf32>
    %186 = arith.mulf %156, %185 : vector<4x16x24xf32>
    %cst_208 = arith.constant dense<0.000000e+00> : vector<16x24xf32>
    %187 = vector.multi_reduction <add>, %186, %cst_208 [0] : vector<4x16x24xf32> to vector<16x24xf32>
    %188 = vector.extract_strided_slice %187 {offsets = [0, 8], sizes = [16, 16], strides = [1, 1]} : vector<16x24xf32> to vector<16x16xf32>
    %c0_209 = arith.constant 0 : index
    %c24 = arith.constant 24 : index
    %c0_210 = arith.constant 0 : index
    %c0_211 = arith.constant 0 : index
    %189 = vector.load %arg3[%c0_209, %c24, %c0_210, %c0_211] : memref<1x25x16x16xf32, #tpu.memory_space<vmem>>, vector<1x1x16x16xf32>
    %190 = vector.shape_cast %189 : vector<1x1x16x16xf32> to vector<16x16xf32>
    %191 = vector.shape_cast %188 : vector<16x16xf32> to vector<1x1x16x16xf32>
    tpu.vector_store %arg3[%c0_209, %c24, %c0_210, %c0_211], %191 {strides = array<i32>} : memref<1x25x16x16xf32, #tpu.memory_space<vmem>>, vector<1x1x16x16xf32>,
    return
  }
  func.func @transform_0(%arg0: i32) -> (i32, i32, i32, i32) {
    %c0_i32 = arith.constant 0 : i32
    %c0_i32_0 = arith.constant 0 : i32
    %c0_i32_1 = arith.constant 0 : i32
    %c0_i32_2 = arith.constant 0 : i32
    return %arg0, %c0_i32, %c0_i32_0, %c0_i32_1 : i32, i32, i32, i32
  }
  func.func @transform_1(%arg0: i32) -> (i32, i32, i32, i32) {
    %c0_i32 = arith.constant 0 : i32
    %c0_i32_0 = arith.constant 0 : i32
    %c0_i32_1 = arith.constant 0 : i32
    %c0_i32_2 = arith.constant 0 : i32
    return %arg0, %c0_i32, %c0_i32_0, %c0_i32_1 : i32, i32, i32, i32
  }
  func.func @transform_2(%arg0: i32) -> (i32, i32, i32, i32) {
    %c0_i32 = arith.constant 0 : i32
    %c0_i32_0 = arith.constant 0 : i32
    %c0_i32_1 = arith.constant 0 : i32
    %c0_i32_2 = arith.constant 0 : i32
    return %arg0, %c0_i32, %c0_i32_0, %c0_i32_1 : i32, i32, i32, i32
  }
}

</mosaic_0001>

<bundles_post_ra>
// kernel: tpu_custom_call.1
= control target key start
LH: loop header
LB: loop body
LE: loop exit
PB: predicated region body
PF: predicated region fallthrough
CT: control target
= control target key end

     0   :  { %7 = vsyncpa [#allocation5], 0  ;;  %s3798_s0 = inlined_call_operand.hbm [shape: f32[2,4,16,16], index: 0, kind: input, shape index: {}]   ;;  %s3799_s1 = inlined_call_operand.hbm [shape: f32[2,4,16,16], index: 1, kind: input, shape index: {}]   ;;  %s3800_s2 = inlined_call_operand.vmem [shape: f32[2,25,16,16], index: 2, kind: output, shape index: {}]  }
   0x1   :  { %9 = vsyncpa [#allocation5 + $0x1], 0 }
   0x2   :  { %10 = vsyncpa [#allocation7], 0 }
   0x3   :  { %12 = vsyncpa [#allocation7 + $0x1], 0  ;;  %s2386_s9 = smov 0   ;;  %s2388_s10 = smov 0  }
   0x4   :  { %s2390_s11 = smov 0   ;;  %s2392_s12 = smov 0  }
   0x5 LB: > { %s2405_s13 = sadd.s32 4294967295, %s2359_s12   ;;  %s2408_s14 = sadd.s32 1, %s2359_s12   ;;  %s2359_s12 = sphi %s2392_s12, %s3851_s12   ;;  %s2355_s11 = sphi %s2390_s11, %s3850_s11   ;;  %s2351_s10 = sphi %s2388_s10, %s3849_s10   ;;  %s2347_s9 = sphi %s2386_s9, %s3848_s9  }
   0x6   : > { %s22_s15 = ssub.s32 %s2359_s12, %s2408_s14  ;;  %s25_s16 = sadd.s32 1, %s2355_s11 }
   0x7   : > { %p23_p0 = scmp.eq.s32.totalorder %s22_s15, 0  ;;  %p32_p1 = scmp.ne.s32.totalorder %s2355_s11, %s2351_s10 }
   0x8   : > { %p33_p2 = scmp.eq.s32.totalorder %s2359_s12, 0  ;;  %p38_p3 = scmp.ne.s32.totalorder %s2351_s10, %s2347_s9 }
   0x9   : > { %s2418_s17 = scalar_select %p23_p0, %s2355_s11, %s25_s16  }
   0xa   : > { %p34_p4 = por %p33_p2, %p32_p1  ;;  %p39_p5 = scmp.eq.s32.totalorder %s2405_s13, 0 }
   0xb   : > { %p2212_p6 = scmp.lt.s32.totalorder %s2359_s12, 2  ;;  %s2427_s19 = sand.u32 1, %s2355_s11  }
   0xc   : > { %p2422_p7 = por %p39_p5, %p38_p3  ;;  %s2138_s20 = sshll.u32 %s2427_s19, 6 }
   0xd   : > { %s2198_s21 = sshll.u32 %s2359_s12, 10  ;;  %s118_s25 = scalar_lea.vmem [#allocation4], %s2138_s20 }
   0xe   : > { %s3813_s18 = scalar_select %p2422_p7, 1, 0 }
   0xf   : > { %s2436_s24 = scalar_lea.hbm %s3798_s0, %s2198_s21  ;;  %s125_s26 = sshll.u32 %s118_s25, 4  ;;  %s2440_s26 = int_to_ptr.vmem [resolvable:$true] %s125_s26 }
  0x10   : > { %p2442_p8 = pnand %p2212_p6, %p34_p4  ;;  %s115_s28 = scalar_lea.sflag [#allocation5], %s2427_s19 }
  0x11   : > { %s2261_s29 = scalar_lea.hbm %s2436_s24, 1024  ;;  %s2266_s4 = scalar_lea.hbm %s3798_s0, 2048 }
  0x12   : > { %p2262_p10 = scmp.ne.s32.totalorder %s2436_s24, %s2261_s29  ;;  %p2263_p11 = pneg %p2442_p8 }
  0x13   : > { %p2267_p0 = scmp.lt.u32.totalorder %s2436_s24, %s3798_s0  ;;  %p2268_p1 = scmp.lt.u32.totalorder %s2266_s4, %s2261_s29 }
  0x14   : > { %p2264_p12 = pnand %p2263_p11, %p2262_p10  ;;  %p2270_p3 = scmp.lt.u32.totalorder %s2261_s29, %s2436_s24 }
  0x15   : > { %p2269_p2 = por %p2268_p1, %p2267_p0 }
  0x16   : > { %p2265_p13 = pneg %p2264_p12 }
  0x17   : > { %p2271_p4 = por %p2270_p3, %p2269_p2 }
  0x19   : > { %p2272_p5 = pnand %p2271_p4, %p2265_p13 }
  0x1b   : > { %2275 = shalt.err (!%p2272_p5)
}
  0x1c   : > { %s2276_s7 = scalar_lea.vmem %s2440_s26, 1024  ;;  %s2361_s8 = smov [#allocation4]  }
  0x1d   : > { %p2277_p6 = scmp.ne.s32.totalorder %s2440_s26, %s2276_s7  ;;  %s2281_s9 = sshll.u32 %s2361_s8, 4  ;;  %s2282_s9 = int_to_ptr.vmem [resolvable:$false] %s2281_s9 }
  0x1e   : > { %s2283_s15 = scalar_lea.vmem %s2282_s9, 2048  ;;  %p2284_p9 = scmp.lt.s32.totalorder %s2440_s26, %s2282_s9 }
  0x1f   : > { %p2279_p10 = pnand %p2277_p6, %p2263_p11  ;;  %p2285_p0 = scmp.lt.s32.totalorder %s2283_s15, %s2276_s7 }
  0x21   : > { %p2280_p12 = pneg %p2279_p10  ;;  %p2286_p1 = por %p2285_p0, %p2284_p9 }
  0x23   : > { %p2287_p2 = pnand %p2286_p1, %p2280_p12 }
  0x25   : > { %2290 = shalt.err (!%p2287_p2)
}
  0x26   : > { %s2362_s16 = smov 128   ;;  %s2363_s22 = smov 8  }
  0x27   : > { %2208 = dma.hbm_to_vmem [thread:$0]  (!%p2442_p8), %s2436_s24, 1024, %s2440_s26, %s115_s28, %s2362_s16, %s2362_s16, %s2363_s22  }
  0x28   : > { %p154_p9 = scmp.lt.s32.totalorder %s2359_s12, 3  ;;  %s2484_s29 = scalar_lea.hbm %s3799_s1, %s2198_s21 }
  0x29   : > { %p3815_p13 = scmp.ge.s32.totalorder %s2359_s12, 1  ;;  %s139_s3 = scalar_lea.vmem [#allocation6], %s2138_s20 }
  0x2a   : > { %s146_s4 = sshll.u32 %s139_s3, 4  ;;  %s136_s24 = scalar_lea.sflag [#allocation7], %s2427_s19  ;;  %s2494_s4 = int_to_ptr.vmem [resolvable:$true] %s146_s4 }
  0x2b   : > { %p2488_p3 = pnand %p3815_p13, %p154_p9  ;;  %s2291_s26 = scalar_lea.hbm %s2484_s29, 1024 }
  0x2c   : > { %p2292_p4 = scmp.ne.s32.totalorder %s2484_s29, %s2291_s26  ;;  %s2296_s28 = scalar_lea.hbm %s3799_s1, 2048 }
  0x2d   : > { %p2297_p10 = scmp.lt.u32.totalorder %s2484_s29, %s3799_s1  ;;  %p2298_p12 = scmp.lt.u32.totalorder %s2296_s28, %s2291_s26 }
  0x2e   : > { %p2294_p5 = pnand %p2292_p4, %p2263_p11  ;;  %p2300_p1 = scmp.lt.u32.totalorder %s2291_s26, %s2484_s29 }
  0x2f   : > { %p2299_p0 = por %p2298_p12, %p2297_p10 }
  0x30   : > { %p2295_p6 = pneg %p2294_p5 }
  0x31   : > { %p2301_p2 = por %p2300_p1, %p2299_p0 }
  0x33   : > { %p2302_p9 = pnand %p2301_p2, %p2295_p6 }
  0x35   : > { %2305 = shalt.err (!%p2302_p9)
}
  0x36   : > { %s2306_s20 = scalar_lea.vmem %s2494_s4, 1024  ;;  %s2364_s7 = smov [#allocation6]  }
  0x37   : > { %p2307_p13 = scmp.ne.s32.totalorder %s2494_s4, %s2306_s20  ;;  %s2311_s8 = sshll.u32 %s2364_s7, 4  ;;  %s2312_s8 = int_to_ptr.vmem [resolvable:$false] %s2311_s8 }
  0x38   : > { %s2313_s9 = scalar_lea.vmem %s2312_s8, 2048  ;;  %p2314_p7 = scmp.lt.s32.totalorder %s2494_s4, %s2312_s8 }
  0x39   : > { %p2309_p4 = pnand %p2307_p13, %p2263_p11  ;;  %p2315_p10 = scmp.lt.s32.totalorder %s2313_s9, %s2306_s20 }
  0x3b   : > { %p2310_p5 = pneg %p2309_p4  ;;  %p2316_p12 = por %p2315_p10, %p2314_p7 }
  0x3d   : > { %p2317_p0 = pnand %p2316_p12, %p2310_p5 }
  0x3f   : > { %2320 = shalt.err (!%p2317_p0)
}
  0x40   : > { %2211 = dma.hbm_to_vmem [thread:$0]  (!%p2442_p8), %s2484_s29, 1024, %s2494_s4, %s136_s24, %s2362_s16, %s2362_s16, %s2363_s22  }
  0x41   : > { %158 = sbr.rel (%p2488_p3) target bundleno = 1268 (0x4f4), region = 28 }
  0x48   : > { %s160_s15 = sand.u32 1, %s2351_s10   ;;  %p3817_p7 = scmp.ne.s32.totalorder %s3813_s18, 0 }
  0x49   : > { %s2145_s23 = sshll.u32 %s160_s15, 6  ;;  %s161_s25 = scalar_lea.sflag [#allocation5], %s160_s15 }
  0x4a   : > { %s2528_s3 = scalar_lea.vmem [#allocation4], %s2145_s23 }
  0x4b   : > { %2338 = dma.done.wait (%p3817_p7), %s161_s25, 1024  }
  0x4c   : > { %2340 = vsyncadd (%p3817_p7), %s161_s25, 4294966272  ;;  %s170_s19 = scalar_lea.sflag [#allocation7], %s160_s15  ;;  %s2534_s27 = scalar_lea.vmem [#allocation6], %s2145_s23 }
  0x4d   : > { %2342 = dma.done.wait (%p3817_p7), %s170_s19, 1024  }
  0x4e   : > { %2344 = vsyncadd (%p3817_p7), %s170_s19, 4294966272  ;;  %vm204_vm0 = vcmask 261120   ;;  %v2365_v0 = vmov 0.0   ;;  %v232_v1 = vld [vmem:[%s2528_s3 + $0x10] sm:$0xff]  ;;  %v230_v2 = vld [vmem:[%s2528_s3] sm:$0xff]  ;;  %s2366_s18 = smov 8  }
  0x4f   : > { %208 = vst.msk [vmem:[#allocation2 + $0x18] sm:$0xff] %vm204_vm0, %v2365_v0  ;;  %209 = vst.msk [vmem:[#allocation2 + $0x20] sm:$0xff] %vm204_vm0, %v2365_v0  ;;  %v233_v3 = vld [vmem:[%s2528_s3 + $0x18] sm:$0xff]  ;;  %v240_v4 = vmul.f32 0.25, %v232_v1  ;;  %v238_v5 = vmul.f32 0.25, %v230_v2  ;;  %v231_v6 = vld [vmem:[%s2528_s3 + $0x8] sm:$0xff] }
  0x50   : > { %205 = vst.msk [vmem:[#allocation2] sm:$0xff] %vm204_vm0, %v2365_v0  ;;  %206 = vst.msk [vmem:[#allocation2 + $0x8] sm:$0xff] %vm204_vm0, %v2365_v0  ;;  %v241_v7 = vmul.f32 0.25, %v233_v3  ;;  %v239_v8 = vmul.f32 0.25, %v231_v6  ;;  %vm217_vm1 = vcmask 195584   ;;  %v235_v9 = vld [vmem:[%s2528_s3 + $0x28] sm:$0xff] }
  0x51   : > { %207 = vst.msk [vmem:[#allocation2 + $0x10] sm:$0xff] %vm204_vm0, %v2365_v0  ;;  %210 = vst.msk [vmem:[#allocation2 + $0x28] sm:$0xff] %vm204_vm0, %v2365_v0  ;;  %258 = vrot.lane.b32.xlu1 %v240_v4, %s2366_s18  ;;  %254 = vrot.lane.b32.xlu0 %v238_v5, %s2366_s18  ;;  %v234_v10 = vld [vmem:[%s2528_s3 + $0x20] sm:$0xff]  ;;  %v243_v11 = vmul.f32 0.25, %v235_v9  ;;  %v237_v13 = vld [vmem:[%s2528_s3 + $0x38] sm:$0xff]  ;;  %s2367_s16 = smov 4  }
  0x52   : > { %211 = vst.msk [vmem:[#allocation2 + $0x30] sm:$0xff] %vm204_vm0, %v2365_v0  ;;  %212 = vst.msk [vmem:[#allocation2 + $0x38] sm:$0xff] %vm204_vm0, %v2365_v0  ;;  %v242_v12 = vmul.f32 0.25, %v234_v10  ;;  %v236_v14 = vld [vmem:[%s2528_s3 + $0x30] sm:$0xff]  ;;  %v245_v15 = vmul.f32 0.25, %v237_v13  ;;  %v288_v17 = vld [vmem:[%s2534_s27 + $0x8] sm:$0xff] }
  0x53   : > { %213 = vst.msk [vmem:[#allocation2 + $0x40] sm:$0xff] %vm204_vm0, %v2365_v0  ;;  %214 = vst.msk [vmem:[#allocation2 + $0x48] sm:$0xff] %vm204_vm0, %v2365_v0  ;;  %v244_v16 = vmul.f32 0.25, %v236_v14  ;;  %v287_v18 = vld [vmem:[%s2534_s27] sm:$0xff]  ;;  %v290_v19 = vld [vmem:[%s2534_s27 + $0x18] sm:$0xff]  ;;  %vm278_vm2 = vcmask 195648  }
  0x54   : > { %215 = vst.msk [vmem:[#allocation2 + $0x50] sm:$0xff] %vm204_vm0, %v2365_v0  ;;  %216 = vst.msk [vmem:[#allocation2 + $0x58] sm:$0xff] %vm204_vm0, %v2365_v0  ;;  %v289_v20 = vld [vmem:[%s2534_s27 + $0x10] sm:$0xff]  ;;  %v292_v21 = vld [vmem:[%s2534_s27 + $0x28] sm:$0xff]  ;;  %vm327_vm3 = vcmask 162848   ;;  %s2368_s22 = smov 6  }
  0x55   : > { %219 = vst.msk [vmem:[#allocation3 + $0x8] sm:$0xff] %vm217_vm1, %v2365_v0  ;;  %220 = vst.msk [vmem:[#allocation3 + $0x10] sm:$0xff] %vm217_vm1, %v2365_v0  ;;  %260 = vrot.lane.b32.xlu1 %v241_v7, %s2366_s18  ;;  %256 = vrot.lane.b32.xlu0 %v239_v8, %s2366_s18  ;;  %v291_v22 = vld [vmem:[%s2534_s27 + $0x20] sm:$0xff]  ;;  %v294_v23 = vld [vmem:[%s2534_s27 + $0x38] sm:$0xff]  ;;  %vm392_vm4 = vcmask 261184   ;;  %s2369_s29 = smov 120  }
  0x56   : > { %218 = vst.msk [vmem:[#allocation3] sm:$0xff] %vm217_vm1, %v2365_v0  ;;  %221 = vst.msk [vmem:[#allocation3 + $0x18] sm:$0xff] %vm217_vm1, %v2365_v0  ;;  %v293_v24 = vld [vmem:[%s2534_s27 + $0x30] sm:$0xff]  ;;  %vm766_vm5 = vcmask 244784   ;;  %p199_p8 = scmp.lt.s32.totalorder %s2405_s13, 1  ;;  %vm1140_vm6 = vcmask 228384  }
  0x57   : > { %222 = vst.msk [vmem:[#allocation3 + $0x20] sm:$0xff] %vm217_vm1, %v2365_v0  ;;  %223 = vst.msk [vmem:[#allocation3 + $0x28] sm:$0xff] %vm217_vm1, %v2365_v0  ;;  %vm415_vm7 = vcmask 130048   ;;  %vm1514_vm8 = vcmask 211984  }
  0x58   : > { %224 = vst.msk [vmem:[#allocation3 + $0x30] sm:$0xff] %vm217_vm1, %v2365_v0  ;;  %225 = vst.msk [vmem:[#allocation3 + $0x38] sm:$0xff] %vm217_vm1, %v2365_v0  ;;  %s3853_s13 = smov (!%p199_p8, %s2405_s13), 1 }
  0x59   : > { %226 = vst.msk [vmem:[#allocation3 + $0x40] sm:$0xff] %vm217_vm1, %v2365_v0  ;;  %227 = vst.msk [vmem:[#allocation3 + $0x48] sm:$0xff] %vm217_vm1, %v2365_v0  ;;  %264 = vrot.lane.b32.xlu1 %v243_v11, %s2366_s18  ;;  %262 = vrot.lane.b32.xlu0 %v242_v12, %s2366_s18  ;;  %s2200_s30 = smul.u32 400, %s3853_s13  ;;  %s2370_s13 = smov 2  }
  0x5a   : > { %228 = vst.msk [vmem:[#allocation3 + $0x50] sm:$0xff] %vm217_vm1, %v2365_v0  ;;  %229 = vst.msk [vmem:[#allocation3 + $0x58] sm:$0xff] %vm217_vm1, %v2365_v0 }
  0x5b   : > { %s3030_s26 = scalar_lea.vmem %s3800_s2, %s2200_s30 }
  0x5d   : > { %268 = vrot.lane.b32.xlu1 %v245_v15, %s2366_s18  ;;  %266 = vrot.lane.b32.xlu0 %v244_v16, %s2366_s18 }
  0x61   : > { %305 = vrot.lane.b32.xlu1 %v288_v17, %s2367_s16  ;;  %303 = vrot.lane.b32.xlu0 %v287_v18, %s2367_s16 }
  0x65   : > { %309 = vrot.lane.b32.xlu1 %v290_v19, %s2367_s16  ;;  %307 = vrot.lane.b32.xlu0 %v289_v20, %s2367_s16 }
  0x69   : > { %313 = vrot.lane.b32.xlu1 %v292_v21, %s2367_s16  ;;  %311 = vrot.lane.b32.xlu0 %v291_v22, %s2367_s16 }
  0x6d   : > { %317 = vrot.lane.b32.xlu1 %v294_v23, %s2367_s16  ;;  %315 = vrot.lane.b32.xlu0 %v293_v24, %s2367_s16 }
  0xc3   : > { %v259_v25 = vpop.permute.xlu1 %258  ;;  %v255_v26 = vpop.permute.xlu0 %254 }
  0xc4   : > { %281 = vst.msk [vmem:[#allocation2 + $0x1c] sm:$0xff] %vm278_vm2, %v259_v25  ;;  %279 = vst.msk [vmem:[#allocation2 + $0x4] sm:$0xff] %vm278_vm2, %v255_v26 }
  0xc7   : > { %v261_v27 = vpop.permute.xlu1 %260  ;;  %v257_v28 = vpop.permute.xlu0 %256 }
  0xc8   : > { %282 = vst.msk [vmem:[#allocation2 + $0x24] sm:$0xff] %vm278_vm2, %v261_v27  ;;  %280 = vst.msk [vmem:[#allocation2 + $0xc] sm:$0xff] %vm278_vm2, %v257_v28 }
  0xcb   : > { %v265_v29 = vpop.permute.xlu1 %264  ;;  %v263_v30 = vpop.permute.xlu0 %262 }
  0xcc   : > { %284 = vst.msk [vmem:[#allocation2 + $0x3c] sm:$0xff] %vm278_vm2, %v265_v29  ;;  %283 = vst.msk [vmem:[#allocation2 + $0x34] sm:$0xff] %vm278_vm2, %v263_v30 }
  0xcf   : > { %v269_v31 = vpop.permute.xlu1 %268  ;;  %v267_v32 = vpop.permute.xlu0 %266 }
  0xd0   : > { %286 = vst.msk [vmem:[#allocation2 + $0x54] sm:$0xff] %vm278_vm2, %v269_v31  ;;  %285 = vst.msk [vmem:[#allocation2 + $0x4c] sm:$0xff] %vm278_vm2, %v267_v32 }
  0xd3   : > { %v306_v33 = vpop.permute.xlu1 %305  ;;  %v304_v34 = vpop.permute.xlu0 %303 }
  0xd4   : > { %329 = vst.msk [vmem:[#allocation3 + $0xc] sm:$0xff] %vm327_vm3, %v306_v33  ;;  %328 = vst.msk [vmem:[#allocation3 + $0x4] sm:$0xff] %vm327_vm3, %v304_v34 }
  0xd7   : > { %v310_v35 = vpop.permute.xlu1 %309  ;;  %v308_v36 = vpop.permute.xlu0 %307 }
  0xd8   : > { %331 = vst.msk [vmem:[#allocation3 + $0x24] sm:$0xff] %vm327_vm3, %v310_v35  ;;  %330 = vst.msk [vmem:[#allocation3 + $0x1c] sm:$0xff] %vm327_vm3, %v308_v36  ;;  %v2766_v35 = vld [vmem:[#allocation2 + $0x24] sm:$0xff]  ;;  %v2768_v36 = vld [vmem:[#allocation2 + $0x1c] sm:$0xff] }
  0xdb   : > { %v314_v37 = vpop.permute.xlu1 %313  ;;  %v312_v38 = vpop.permute.xlu0 %311  ;;  %v2596_v39 = vld [vmem:[#allocation3 + $0x8] sm:$0xff]  ;;  %v2598_v40 = vld [vmem:[#allocation3] sm:$0xff]  ;;  %v638_v9 = vld [vmem:[#allocation3 + $0x10] sm:$0xff] }
  0xdc   : > { %333 = vst.msk [vmem:[#allocation3 + $0x3c] sm:$0xff] %vm327_vm3, %v314_v37  ;;  %332 = vst.msk [vmem:[#allocation3 + $0x34] sm:$0xff] %vm327_vm3, %v312_v38  ;;  %362 = vrot.lane.b32.xlu1 %v2596_v39, %s2366_s18  ;;  %360 = vrot.lane.b32.xlu0 %v2598_v40, %s2366_s18  ;;  %v2632_v49 = vld [vmem:[#allocation3 + $0xa] sm:$0xff]  ;;  %v2634_v50 = vld [vmem:[#allocation3 + $0x2] sm:$0xff] }
  0xdd   : > { %v492_v57 = vld [vmem:[#allocation3 + $0xc] sm:$0xff]  ;;  %v491_v58 = vld [vmem:[#allocation3 + $0x4] sm:$0xff] }
  0xde   : > { %v565_v1 = vld [vmem:[#allocation3 + $0xe] sm:$0xff]  ;;  %v564_v2 = vld [vmem:[#allocation3 + $0x6] sm:$0xff] }
  0xdf   : > { %v318_v41 = vpop.permute.xlu1 %317  ;;  %v316_v42 = vpop.permute.xlu0 %315  ;;  %v2606_v43 = vld [vmem:[#allocation3 + $0x20] sm:$0xff]  ;;  %v2608_v44 = vld [vmem:[#allocation3 + $0x18] sm:$0xff]  ;;  %v640_v10 = vld [vmem:[#allocation3 + $0x28] sm:$0xff] }
  0xe0   : > { %335 = vst.msk [vmem:[#allocation3 + $0x54] sm:$0xff] %vm327_vm3, %v318_v41  ;;  %334 = vst.msk [vmem:[#allocation3 + $0x4c] sm:$0xff] %vm327_vm3, %v316_v42  ;;  %366 = vrot.lane.b32.xlu1 %v2606_v43, %s2366_s18  ;;  %364 = vrot.lane.b32.xlu0 %v2608_v44, %s2366_s18  ;;  %v2640_v51 = vld [vmem:[#allocation3 + $0x22] sm:$0xff]  ;;  %v2642_v52 = vld [vmem:[#allocation3 + $0x1a] sm:$0xff] }
  0xe1   : > { %v494_v59 = vld [vmem:[#allocation3 + $0x24] sm:$0xff]  ;;  %v493_v60 = vld [vmem:[#allocation3 + $0x1c] sm:$0xff] }
  0xe2   : > { %v567_v3 = vld [vmem:[#allocation3 + $0x26] sm:$0xff]  ;;  %v566_v4 = vld [vmem:[#allocation3 + $0x1e] sm:$0xff] }
  0xe3   : > { %v2616_v45 = vld [vmem:[#allocation3 + $0x38] sm:$0xff]  ;;  %v2618_v46 = vld [vmem:[#allocation3 + $0x30] sm:$0xff]  ;;  %v642_v11 = vld [vmem:[#allocation3 + $0x40] sm:$0xff] }
  0xe4   : > { %370 = vrot.lane.b32.xlu1 %v2616_v45, %s2366_s18  ;;  %368 = vrot.lane.b32.xlu0 %v2618_v46, %s2366_s18  ;;  %v2648_v53 = vld [vmem:[#allocation3 + $0x3a] sm:$0xff]  ;;  %v2650_v54 = vld [vmem:[#allocation3 + $0x32] sm:$0xff] }
  0xe5   : > { %v496_v61 = vld [vmem:[#allocation3 + $0x3c] sm:$0xff]  ;;  %v495_v62 = vld [vmem:[#allocation3 + $0x34] sm:$0xff] }
  0xe6   : > { %v569_v5 = vld [vmem:[#allocation3 + $0x3e] sm:$0xff]  ;;  %v568_v6 = vld [vmem:[#allocation3 + $0x36] sm:$0xff] }
  0xe7   : > { %v2624_v47 = vld [vmem:[#allocation3 + $0x50] sm:$0xff]  ;;  %v2626_v48 = vld [vmem:[#allocation3 + $0x48] sm:$0xff]  ;;  %v2683_v12 = vld [vmem:[#allocation3 + $0x58] sm:$0xff] }
  0xe8   : > { %374 = vrot.lane.b32.xlu1 %v2624_v47, %s2366_s18  ;;  %372 = vrot.lane.b32.xlu0 %v2626_v48, %s2366_s18  ;;  %v425_v55 = vld [vmem:[#allocation3 + $0x52] sm:$0xff]  ;;  %v424_v56 = vld [vmem:[#allocation3 + $0x4a] sm:$0xff] }
  0xe9   : > { %v498_v63 = vld [vmem:[#allocation3 + $0x54] sm:$0xff]  ;;  %v497_v0 = vld [vmem:[#allocation3 + $0x4c] sm:$0xff] }
  0xea   : > { %v571_v7 = vld [vmem:[#allocation3 + $0x56] sm:$0xff]  ;;  %v570_v8 = vld [vmem:[#allocation3 + $0x4e] sm:$0xff] }
  0xec   : > { %436 = vrot.lane.b32.xlu1 %v2632_v49, %s2366_s18  ;;  %434 = vrot.lane.b32.xlu0 %v2634_v50, %s2366_s18 }
  0xf0   : > { %440 = vrot.lane.b32.xlu1 %v2640_v51, %s2366_s18  ;;  %438 = vrot.lane.b32.xlu0 %v2642_v52, %s2366_s18 }
  0xf4   : > { %444 = vrot.lane.b32.xlu1 %v2648_v53, %s2366_s18  ;;  %442 = vrot.lane.b32.xlu0 %v2650_v54, %s2366_s18 }
  0xf8   : > { %448 = vrot.lane.b32.xlu1 %v425_v55, %s2366_s18  ;;  %446 = vrot.lane.b32.xlu0 %v424_v56, %s2366_s18 }
  0xfc   : > { %509 = vrot.lane.b32.xlu1 %v492_v57, %s2366_s18  ;;  %507 = vrot.lane.b32.xlu0 %v491_v58, %s2366_s18 }
 0x100   : > { %513 = vrot.lane.b32.xlu1 %v494_v59, %s2366_s18  ;;  %511 = vrot.lane.b32.xlu0 %v493_v60, %s2366_s18 }
 0x104   : > { %517 = vrot.lane.b32.xlu1 %v496_v61, %s2366_s18  ;;  %515 = vrot.lane.b32.xlu0 %v495_v62, %s2366_s18 }
 0x108   : > { %521 = vrot.lane.b32.xlu1 %v498_v63, %s2366_s18  ;;  %519 = vrot.lane.b32.xlu0 %v497_v0, %s2366_s18 }
 0x10c   : > { %582 = vrot.lane.b32.xlu1 %v565_v1, %s2366_s18  ;;  %580 = vrot.lane.b32.xlu0 %v564_v2, %s2366_s18 }
 0x110   : > { %586 = vrot.lane.b32.xlu1 %v567_v3, %s2366_s18  ;;  %584 = vrot.lane.b32.xlu0 %v566_v4, %s2366_s18 }
 0x114   : > { %590 = vrot.lane.b32.xlu1 %v569_v5, %s2366_s18  ;;  %588 = vrot.lane.b32.xlu0 %v568_v6, %s2366_s18 }
 0x118   : > { %594 = vrot.lane.b32.xlu1 %v571_v7, %s2366_s18  ;;  %592 = vrot.lane.b32.xlu0 %v570_v8, %s2366_s18 }
 0x11c   : > { %655 = vrot.lane.b32.xlu1 %v638_v9, %s2366_s18  ;;  %653 = vrot.lane.b32.xlu0 %v2596_v39, %s2366_s18 }
 0x120   : > { %659 = vrot.lane.b32.xlu1 %v640_v10, %s2366_s18  ;;  %657 = vrot.lane.b32.xlu0 %v2606_v43, %s2366_s18 }
 0x124   : > { %663 = vrot.lane.b32.xlu1 %v642_v11, %s2366_s18  ;;  %661 = vrot.lane.b32.xlu0 %v2616_v45, %s2366_s18 }
 0x128   : > { %667 = vrot.lane.b32.xlu1 %v2683_v12, %s2366_s18  ;;  %665 = vrot.lane.b32.xlu0 %v2624_v47, %s2366_s18 }
 0x12c   : > { %736 = vrot.lane.b32.xlu1 %v2596_v39, %s2368_s22  ;;  %734 = vrot.lane.b32.xlu0 %v2598_v40, %s2368_s22 }
 0x130   : > { %740 = vrot.lane.b32.xlu1 %v2606_v43, %s2368_s22  ;;  %738 = vrot.lane.b32.xlu0 %v2608_v44, %s2368_s22 }
 0x134   : > { %744 = vrot.lane.b32.xlu1 %v2616_v45, %s2368_s22  ;;  %742 = vrot.lane.b32.xlu0 %v2618_v46, %s2368_s22 }
 0x138   : > { %748 = vrot.lane.b32.xlu1 %v2624_v47, %s2368_s22  ;;  %746 = vrot.lane.b32.xlu0 %v2626_v48, %s2368_s22 }
 0x13c   : > { %810 = vrot.lane.b32.xlu1 %v2632_v49, %s2368_s22  ;;  %808 = vrot.lane.b32.xlu0 %v2634_v50, %s2368_s22 }
 0x140   : > { %814 = vrot.lane.b32.xlu1 %v2640_v51, %s2368_s22  ;;  %812 = vrot.lane.b32.xlu0 %v2642_v52, %s2368_s22  ;;  %v2776_v51 = vld [vmem:[#allocation2 + $0xc] sm:$0xff]  ;;  %v2778_v52 = vld [vmem:[#allocation2 + $0x4] sm:$0xff] }
 0x144   : > { %818 = vrot.lane.b32.xlu1 %v2648_v53, %s2368_s22  ;;  %816 = vrot.lane.b32.xlu0 %v2650_v54, %s2368_s22 }
 0x148   : > { %822 = vrot.lane.b32.xlu1 %v425_v55, %s2368_s22  ;;  %820 = vrot.lane.b32.xlu0 %v424_v56, %s2368_s22  ;;  %v2786_v55 = vld [vmem:[#allocation2 + $0x3c] sm:$0xff]  ;;  %v2788_v56 = vld [vmem:[#allocation2 + $0x34] sm:$0xff] }
 0x14c   : > { %883 = vrot.lane.b32.xlu1 %v492_v57, %s2368_s22  ;;  %881 = vrot.lane.b32.xlu0 %v491_v58, %s2368_s22 }
 0x14e   : > { %v363_v13 = vpop.permute.xlu1 %362  ;;  %v361_v14 = vpop.permute.xlu0 %360 }
 0x14f   : > { %v385_v53 = vmul.f32 %v363_v13, %v2776_v51  ;;  %v384_v54 = vmul.f32 %v361_v14, %v2778_v52 }
 0x150   : > { %887 = vrot.lane.b32.xlu1 %v494_v59, %s2368_s22  ;;  %885 = vrot.lane.b32.xlu0 %v493_v60, %s2368_s22 }
 0x152   : > { %v367_v15 = vpop.permute.xlu1 %366  ;;  %v365_v16 = vpop.permute.xlu0 %364 }
 0x153   : > { %v387_v41 = vmul.f32 %v367_v15, %v2766_v35  ;;  %v386_v42 = vmul.f32 %v365_v16, %v2768_v36 }
 0x154   : > { %891 = vrot.lane.b32.xlu1 %v496_v61, %s2368_s22  ;;  %889 = vrot.lane.b32.xlu0 %v495_v62, %s2368_s22  ;;  %v2798_v61 = vld [vmem:[#allocation2 + $0x54] sm:$0xff]  ;;  %v400_v62 = vsel %vm392_vm4, %v385_v53, 0.0 }
 0x155   : > { %v401_v59 = vsel %vm392_vm4, %v387_v41, 0.0 }
 0x156   : > { %v371_v17 = vpop.permute.xlu1 %370  ;;  %v369_v18 = vpop.permute.xlu0 %368 }
 0x157   : > { %v389_v60 = vmul.f32 %v371_v17, %v2786_v55 }
 0x158   : > { %895 = vrot.lane.b32.xlu1 %v498_v63, %s2368_s22  ;;  %893 = vrot.lane.b32.xlu0 %v497_v0, %s2368_s22  ;;  %v393_v63 = vsel %vm392_vm4, %v384_v54, 0.0 }
 0x15a   : > { %v375_v19 = vpop.permute.xlu1 %374  ;;  %v2727_v20 = vpop.permute.xlu0 %372 }
 0x15b   : > { %v391_v0 = vmul.f32 %v375_v19, %v2798_v61 }
 0x15c   : > { %956 = vrot.lane.b32.xlu1 %v565_v1, %s2368_s22  ;;  %954 = vrot.lane.b32.xlu0 %v564_v2, %s2368_s22  ;;  %v402_v1 = vadd.f32 %v401_v59, %v400_v62 }
 0x15e   : > { %v2731_v21 = vpop.permute.xlu1 %436  ;;  %v2733_v22 = vpop.permute.xlu0 %434 }
 0x160   : > { %960 = vrot.lane.b32.xlu1 %v567_v3, %s2368_s22  ;;  %958 = vrot.lane.b32.xlu0 %v566_v4, %s2368_s22 }
 0x162   : > { %v441_v23 = vpop.permute.xlu1 %440  ;;  %v439_v24 = vpop.permute.xlu0 %438 }
 0x164   : > { %964 = vrot.lane.b32.xlu1 %v569_v5, %s2368_s22  ;;  %962 = vrot.lane.b32.xlu0 %v568_v6, %s2368_s22  ;;  %v403_v5 = vsel %vm392_vm4, %v389_v60, 0.0 }
 0x165   : > { %v404_v14 = vadd.f32 %v403_v5, %v402_v1 }
 0x166   : > { %v445_v25 = vpop.permute.xlu1 %444  ;;  %v443_v26 = vpop.permute.xlu0 %442 }
 0x167   : > { %v462_v13 = vmul.f32 %v443_v26, %v2788_v56 }
 0x168   : > { %968 = vrot.lane.b32.xlu1 %v571_v7, %s2368_s22  ;;  %966 = vrot.lane.b32.xlu0 %v570_v8, %s2368_s22  ;;  %v2809_v7 = vld [vmem:[#allocation2 + $0x4c] sm:$0xff] }
 0x169   : > { %v390_v8 = vmul.f32 %v2727_v20, %v2809_v7  ;;  %v469_v26 = vsel %vm392_vm4, %v462_v13, 0.0 }
 0x16a   : > { %v449_v27 = vpop.permute.xlu1 %448  ;;  %v2741_v28 = vpop.permute.xlu0 %446 }
 0x16b   : > { %v465_v16 = vmul.f32 %v449_v27, %v2798_v61 }
 0x16c   : > { %1029 = vrot.lane.b32.xlu1 %v638_v9, %s2368_s22  ;;  %1027 = vrot.lane.b32.xlu0 %v2596_v39, %s2368_s22  ;;  %v459_v9 = vmul.f32 %v2731_v21, %v2776_v51 }
 0x16e   : > { %v2746_v29 = vpop.permute.xlu1 %509  ;;  %v2748_v30 = vpop.permute.xlu0 %507 }
 0x16f   : > { %v532_v27 = vmul.f32 %v2746_v29, %v2776_v51 }
 0x170   : > { %1033 = vrot.lane.b32.xlu1 %v640_v10, %s2368_s22  ;;  %1031 = vrot.lane.b32.xlu0 %v2606_v43, %s2368_s22  ;;  %v458_v10 = vmul.f32 %v2733_v22, %v2778_v52  ;;  %v398_v22 = vsel %vm392_vm4, %v390_v8, 0.0 }
 0x172   : > { %v514_v31 = vpop.permute.xlu1 %513  ;;  %v2753_v32 = vpop.permute.xlu0 %511 }
 0x174   : > { %1037 = vrot.lane.b32.xlu1 %v642_v11, %s2368_s22  ;;  %1035 = vrot.lane.b32.xlu0 %v2616_v45, %s2368_s22  ;;  %v405_v11 = vsel %vm392_vm4, %v391_v0, 0.0 }
 0x175   : > { %v406_v21 = vadd.f32 %v405_v11, %v404_v14 }
 0x176   : > { %v2758_v33 = vpop.permute.xlu1 %517  ;;  %v2760_v34 = vpop.permute.xlu0 %515 }
 0x177   : > { %v535_v29 = vmul.f32 %v2760_v34, %v2788_v56 }
 0x178   : > { %1041 = vrot.lane.b32.xlu1 %v2683_v12, %s2368_s22  ;;  %1039 = vrot.lane.b32.xlu0 %v2624_v47, %s2368_s22  ;;  %v463_v12 = vmul.f32 %v445_v25, %v2786_v55 }
 0x17a   : > { %v2770_v37 = vpop.permute.xlu1 %521  ;;  %v2772_v38 = vpop.permute.xlu0 %519  ;;  %v476_v25 = vsel %vm392_vm4, %v463_v12, 0.0 }
 0x17c   : > { %1110 = vrot.lane.b32.xlu1 %v2596_v39, %s2367_s16  ;;  %1108 = vrot.lane.b32.xlu0 %v2598_v40, %s2367_s16  ;;  %v394_v39 = vsel %vm392_vm4, %v386_v42, 0.0  ;;  %v388_v40 = vmul.f32 %v369_v18, %v2788_v56  ;;  %v478_v42 = vsel %vm392_vm4, %v465_v16, 0.0 }
 0x17d   : > { %v395_v2 = vadd.f32 %v394_v39, %v393_v63  ;;  %v536_v39 = vmul.f32 %v2758_v33, %v2786_v55  ;;  %v538_v63 = vmul.f32 %v2770_v37, %v2798_v61  ;;  %v537_v33 = vmul.f32 %v2772_v38, %v2809_v7 }
 0x17e   : > { %v2790_v57 = vpop.permute.xlu1 %582  ;;  %v2792_v58 = vpop.permute.xlu0 %580  ;;  %v396_v6 = vsel %vm392_vm4, %v388_v40, 0.0 }
 0x17f   : > { %v397_v15 = vadd.f32 %v396_v6, %v395_v2  ;;  %v549_v6 = vsel %vm392_vm4, %v536_v39, 0.0  ;;  %v605_v37 = vmul.f32 %v2790_v57, %v2776_v51  ;;  %v604_v38 = vmul.f32 %v2792_v58, %v2778_v52 }
 0x180   : > { %1114 = vrot.lane.b32.xlu1 %v2606_v43, %s2367_s16  ;;  %1112 = vrot.lane.b32.xlu0 %v2608_v44, %s2367_s16  ;;  %v461_v43 = vmul.f32 %v441_v23, %v2766_v35  ;;  %v460_v44 = vmul.f32 %v439_v24, %v2768_v36  ;;  %v473_v23 = vsel %vm392_vm4, %v459_v9, 0.0  ;;  %v466_v24 = vsel %vm392_vm4, %v458_v10, 0.0 }
 0x181   : > { %v551_v9 = vsel %vm392_vm4, %v538_v63, 0.0  ;;  %v544_v10 = vsel %vm392_vm4, %v537_v33, 0.0 }
 0x182   : > { %v587_v3 = vpop.permute.xlu1 %586  ;;  %v585_v4 = vpop.permute.xlu0 %584  ;;  %v474_v19 = vsel %vm392_vm4, %v461_v43, 0.0  ;;  %v467_v20 = vsel %vm392_vm4, %v460_v44, 0.0 }
 0x183   : > { %v468_v41 = vadd.f32 %v467_v20, %v466_v24  ;;  %v607_v43 = vmul.f32 %v587_v3, %v2766_v35  ;;  %v606_v44 = vmul.f32 %v585_v4, %v2768_v36 }
 0x184   : > { %1118 = vrot.lane.b32.xlu1 %v2616_v45, %s2367_s16  ;;  %1116 = vrot.lane.b32.xlu0 %v2618_v46, %s2367_s16  ;;  %v464_v45 = vmul.f32 %v2741_v28, %v2809_v7  ;;  %v534_v46 = vmul.f32 %v514_v31, %v2766_v35  ;;  %v533_v28 = vmul.f32 %v2753_v32, %v2768_v36 }
 0x185   : > { %v475_v31 = vadd.f32 %v474_v19, %v473_v23  ;;  %v399_v32 = vadd.f32 %v398_v22, %v397_v15  ;;  %v470_v40 = vadd.f32 %v469_v26, %v468_v41  ;;  %v620_v15 = vsel %vm392_vm4, %v607_v43, 0.0 }
 0x186   : > { %v591_v17 = vpop.permute.xlu1 %590  ;;  %v589_v18 = vpop.permute.xlu0 %588  ;;  %v547_v59 = vsel %vm392_vm4, %v534_v46, 0.0  ;;  %v540_v62 = vsel %vm392_vm4, %v533_v28, 0.0  ;;  %v613_v16 = vsel %vm392_vm4, %v606_v44, 0.0  ;;  %v612_v46 = vsel %vm392_vm4, %v604_v38, 0.0 }
 0x187   : > { %v477_v60 = vadd.f32 %v476_v25, %v475_v31  ;;  %v609_v3 = vmul.f32 %v591_v17, %v2786_v55  ;;  %v608_v4 = vmul.f32 %v589_v18, %v2788_v56  ;;  %v619_v18 = vsel %vm392_vm4, %v605_v37, 0.0 }
 0x188   : > { %1122 = vrot.lane.b32.xlu1 %v2624_v47, %s2367_s16  ;;  %1120 = vrot.lane.b32.xlu0 %v2626_v48, %s2367_s16  ;;  %v531_v47 = vmul.f32 %v2748_v30, %v2778_v52  ;;  %v471_v48 = vsel %vm392_vm4, %v464_v45, 0.0  ;;  %v546_v30 = vsel %vm392_vm4, %v532_v27, 0.0  ;;  %v621_v25 = vadd.f32 %v620_v15, %v619_v18 }
 0x189   : > { %v479_v34 = vadd.f32 %v478_v42, %v477_v60  ;;  %v472_v0 = vadd.f32 %v471_v48, %v470_v40  ;;  %v548_v2 = vadd.f32 %v547_v59, %v546_v30  ;;  %v615_v22 = vsel %vm392_vm4, %v608_v4, 0.0 }
 0x18a   : > { %v595_v53 = vpop.permute.xlu1 %594  ;;  %v593_v54 = vpop.permute.xlu0 %592  ;;  %v539_v1 = vsel %vm392_vm4, %v531_v47, 0.0  ;;  %v614_v26 = vadd.f32 %v613_v16, %v612_v46 }
 0x18b   : > { %v541_v8 = vadd.f32 %v540_v62, %v539_v1  ;;  %v550_v11 = vadd.f32 %v549_v6, %v548_v2  ;;  %v611_v57 = vmul.f32 %v595_v53, %v2798_v61  ;;  %v610_v13 = vmul.f32 %v593_v54, %v2809_v7 }
 0x18c   : > { %1184 = vrot.lane.b32.xlu1 %v2632_v49, %s2367_s16  ;;  %1182 = vrot.lane.b32.xlu0 %v2634_v50, %s2367_s16  ;;  %v542_v50 = vsel %vm392_vm4, %v535_v29, 0.0  ;;  %v616_v59 = vadd.f32 %v615_v22, %v614_v26 }
 0x18d   : > { %v543_v12 = vadd.f32 %v542_v50, %v541_v8  ;;  %v552_v45 = vadd.f32 %v551_v9, %v550_v11  ;;  %v624_v27 = vsel %vm392_vm4, %v611_v57, 0.0  ;;  %v617_v28 = vsel %vm392_vm4, %v610_v13, 0.0 }
 0x18e   : > { %v656_v5 = vpop.permute.xlu1 %655  ;;  %v654_v49 = vpop.permute.xlu0 %653  ;;  %v618_v30 = vadd.f32 %v617_v28, %v616_v59 }
 0x18f   : > { %v545_v17 = vadd.f32 %v544_v10, %v543_v12  ;;  %v678_v23 = vmul.f32 %v656_v5, %v2776_v51  ;;  %v677_v24 = vmul.f32 %v654_v49, %v2778_v52 }
 0x190   : > { %411 = vrot.lane.b32.xlu1 %v406_v21, %s2369_s29  ;;  %409 = vrot.lane.b32.xlu0 %v399_v32, %s2369_s29  ;;  %v622_v21 = vsel %vm392_vm4, %v609_v3, 0.0 }
 0x191   : > { %v623_v48 = vadd.f32 %v622_v21, %v621_v25  ;;  %v692_v39 = vsel %vm392_vm4, %v678_v23, 0.0  ;;  %v685_v29 = vsel %vm392_vm4, %v677_v24, 0.0 }
 0x192   : > { %v660_v58 = vpop.permute.xlu1 %659  ;;  %v658_v14 = vpop.permute.xlu0 %657 }
 0x193   : > { %v680_v19 = vmul.f32 %v660_v58, %v2766_v35  ;;  %v679_v20 = vmul.f32 %v658_v14, %v2768_v36  ;;  %v625_v40 = vadd.f32 %v624_v27, %v623_v48 }
 0x194   : > { %484 = vrot.lane.b32.xlu1 %v479_v34, %s2369_s29  ;;  %482 = vrot.lane.b32.xlu0 %v472_v0, %s2369_s29 }
 0x195   : > { %v693_v42 = vsel %vm392_vm4, %v680_v19, 0.0  ;;  %v686_v47 = vsel %vm392_vm4, %v679_v20, 0.0 }
 0x196   : > { %v664_v31 = vpop.permute.xlu1 %663  ;;  %v662_v41 = vpop.permute.xlu0 %661  ;;  %v694_v62 = vadd.f32 %v693_v42, %v692_v39  ;;  %v687_v63 = vadd.f32 %v686_v47, %v685_v29 }
 0x197   : > { %v682_v53 = vmul.f32 %v664_v31, %v2786_v55  ;;  %v681_v54 = vmul.f32 %v662_v41, %v2788_v56 }
 0x198   : > { %557 = vrot.lane.b32.xlu1 %v552_v45, %s2369_s29  ;;  %555 = vrot.lane.b32.xlu0 %v545_v17, %s2369_s29 }
 0x199   : > { %v695_v32 = vsel %vm392_vm4, %v682_v53, 0.0  ;;  %v688_v60 = vsel %vm392_vm4, %v681_v54, 0.0 }
 0x19a   : > { %v668_v33 = vpop.permute.xlu1 %667  ;;  %v666_v34 = vpop.permute.xlu0 %665  ;;  %v696_v2 = vadd.f32 %v695_v32, %v694_v62  ;;  %v689_v5 = vadd.f32 %v688_v60, %v687_v63 }
 0x19b   : > { %v684_v0 = vmul.f32 %v668_v33, %v2798_v61  ;;  %v683_v1 = vmul.f32 %v666_v34, %v2809_v7 }
 0x19c   : > { %630 = vrot.lane.b32.xlu1 %v625_v40, %s2369_s29  ;;  %628 = vrot.lane.b32.xlu0 %v618_v30, %s2369_s29 }
 0x19d   : > { %v697_v49 = vsel %vm392_vm4, %v684_v0, 0.0  ;;  %v690_v6 = vsel %vm392_vm4, %v683_v1, 0.0 }
 0x19e   : > { %v698_v50 = vadd.f32 %v697_v49, %v696_v2  ;;  %v691_v43 = vadd.f32 %v690_v6, %v689_v5  ;;  %v737_v44 = vpop.permute.xlu1 %736  ;;  %v735_v8 = vpop.permute.xlu0 %734 }
 0x19f   : > { %v759_v3 = vmul.f32 %v737_v44, %v2776_v51  ;;  %v758_v4 = vmul.f32 %v735_v8, %v2778_v52 }
 0x1a0   : > { %703 = vrot.lane.b32.xlu1 %v698_v50, %s2369_s29  ;;  %701 = vrot.lane.b32.xlu0 %v691_v43, %s2369_s29 }
 0x1a1   : > { %v774_v15 = vsel %vm766_vm5, %v759_v3, 0.0  ;;  %v767_v16 = vsel %vm766_vm5, %v758_v4, 0.0 }
 0x1a2   : > { %v741_v37 = vpop.permute.xlu1 %740  ;;  %v739_v38 = vpop.permute.xlu0 %738 }
 0x1a3   : > { %v761_v9 = vmul.f32 %v741_v37, %v2766_v35  ;;  %v760_v10 = vmul.f32 %v739_v38, %v2768_v36 }
 0x1a5   : > { %v775_v57 = vsel %vm766_vm5, %v761_v9, 0.0  ;;  %v768_v13 = vsel %vm766_vm5, %v760_v10, 0.0 }
 0x1a6   : > { %v745_v11 = vpop.permute.xlu1 %744  ;;  %v743_v12 = vpop.permute.xlu0 %742  ;;  %v776_v45 = vadd.f32 %v775_v57, %v774_v15  ;;  %v769_v17 = vadd.f32 %v768_v13, %v767_v16 }
 0x1a7   : > { %v763_v58 = vmul.f32 %v745_v11, %v2786_v55  ;;  %v762_v14 = vmul.f32 %v743_v12, %v2788_v56 }
 0x1a9   : > { %v777_v19 = vsel %vm766_vm5, %v763_v58, 0.0  ;;  %v770_v20 = vsel %vm766_vm5, %v762_v14, 0.0 }
 0x1aa   : > { %v749_v18 = vpop.permute.xlu1 %748  ;;  %v747_v46 = vpop.permute.xlu0 %746  ;;  %v778_v23 = vadd.f32 %v777_v19, %v776_v45  ;;  %v771_v24 = vadd.f32 %v770_v20, %v769_v17 }
 0x1ab   : > { %v765_v21 = vmul.f32 %v749_v18, %v2798_v61  ;;  %v764_v22 = vmul.f32 %v747_v46, %v2809_v7 }
 0x1ad   : > { %v779_v25 = vsel %vm766_vm5, %v765_v21, 0.0  ;;  %v772_v26 = vsel %vm766_vm5, %v764_v22, 0.0 }
 0x1ae   : > { %v780_v27 = vadd.f32 %v779_v25, %v778_v23  ;;  %v773_v28 = vadd.f32 %v772_v26, %v771_v24  ;;  %v811_v31 = vpop.permute.xlu1 %810  ;;  %v809_v41 = vpop.permute.xlu0 %808 }
 0x1af   : > { %v833_v48 = vmul.f32 %v811_v31, %v2776_v51  ;;  %v832_v59 = vmul.f32 %v809_v41, %v2778_v52 }
 0x1b0   : > { %785 = vrot.lane.b32.xlu1 %v780_v27, %s2369_s29  ;;  %783 = vrot.lane.b32.xlu0 %v773_v28, %s2369_s29 }
 0x1b1   : > { %v847_v62 = vsel %vm766_vm5, %v833_v48, 0.0  ;;  %v840_v63 = vsel %vm766_vm5, %v832_v59, 0.0 }
 0x1b2   : > { %v815_v42 = vpop.permute.xlu1 %814  ;;  %v813_v47 = vpop.permute.xlu0 %812 }
 0x1b3   : > { %v835_v53 = vmul.f32 %v815_v42, %v2766_v35  ;;  %v834_v54 = vmul.f32 %v813_v47, %v2768_v36 }
 0x1b5   : > { %v848_v32 = vsel %vm766_vm5, %v835_v53, 0.0  ;;  %v841_v60 = vsel %vm766_vm5, %v834_v54, 0.0 }
 0x1b6   : > { %v819_v39 = vpop.permute.xlu1 %818  ;;  %v817_v29 = vpop.permute.xlu0 %816  ;;  %v849_v0 = vadd.f32 %v848_v32, %v847_v62  ;;  %v842_v1 = vadd.f32 %v841_v60, %v840_v63 }
 0x1b7   : > { %v837_v40 = vmul.f32 %v819_v39, %v2786_v55  ;;  %v836_v30 = vmul.f32 %v817_v29, %v2788_v56 }
 0x1b9   : > { %v850_v33 = vsel %vm766_vm5, %v837_v40, 0.0  ;;  %v843_v34 = vsel %vm766_vm5, %v836_v30, 0.0 }
 0x1ba   : > { %v823_v2 = vpop.permute.xlu1 %822  ;;  %v821_v5 = vpop.permute.xlu0 %820  ;;  %v851_v50 = vadd.f32 %v850_v33, %v849_v0  ;;  %v844_v43 = vadd.f32 %v843_v34, %v842_v1 }
 0x1bb   : > { %v839_v49 = vmul.f32 %v823_v2, %v2798_v61  ;;  %v838_v6 = vmul.f32 %v821_v5, %v2809_v7 }
 0x1bd   : > { %v852_v44 = vsel %vm766_vm5, %v839_v49, 0.0  ;;  %v845_v8 = vsel %vm766_vm5, %v838_v6, 0.0 }
 0x1be   : > { %v853_v37 = vadd.f32 %v852_v44, %v851_v50  ;;  %v846_v38 = vadd.f32 %v845_v8, %v844_v43  ;;  %v884_v9 = vpop.permute.xlu1 %883  ;;  %v882_v10 = vpop.permute.xlu0 %881 }
 0x1bf   : > { %v906_v57 = vmul.f32 %v884_v9, %v2776_v51  ;;  %v905_v13 = vmul.f32 %v882_v10, %v2778_v52 }
 0x1c0   : > { %858 = vrot.lane.b32.xlu1 %v853_v37, %s2369_s29  ;;  %856 = vrot.lane.b32.xlu0 %v846_v38, %s2369_s29 }
 0x1c1   : > { %v920_v45 = vsel %vm766_vm5, %v906_v57, 0.0  ;;  %v913_v17 = vsel %vm766_vm5, %v905_v13, 0.0 }
 0x1c2   : > { %v888_v3 = vpop.permute.xlu1 %887  ;;  %v886_v4 = vpop.permute.xlu0 %885 }
 0x1c3   : > { %v908_v11 = vmul.f32 %v888_v3, %v2766_v35  ;;  %v907_v12 = vmul.f32 %v886_v4, %v2768_v36 }
 0x1c5   : > { %v921_v15 = vsel %vm766_vm5, %v908_v11, 0.0  ;;  %v914_v16 = vsel %vm766_vm5, %v907_v12, 0.0 }
 0x1c6   : > { %v892_v58 = vpop.permute.xlu1 %891  ;;  %v890_v14 = vpop.permute.xlu0 %889  ;;  %v922_v21 = vadd.f32 %v921_v15, %v920_v45  ;;  %v915_v22 = vadd.f32 %v914_v16, %v913_v17 }
 0x1c7   : > { %v910_v19 = vmul.f32 %v892_v58, %v2786_v55  ;;  %v909_v20 = vmul.f32 %v890_v14, %v2788_v56 }
 0x1c9   : > { %v923_v18 = vsel %vm766_vm5, %v910_v19, 0.0  ;;  %v916_v46 = vsel %vm766_vm5, %v909_v20, 0.0 }
 0x1ca   : > { %v896_v23 = vpop.permute.xlu1 %895  ;;  %v894_v24 = vpop.permute.xlu0 %893  ;;  %v924_v27 = vadd.f32 %v923_v18, %v922_v21  ;;  %v917_v28 = vadd.f32 %v916_v46, %v915_v22 }
 0x1cb   : > { %v912_v25 = vmul.f32 %v896_v23, %v2798_v61  ;;  %v911_v26 = vmul.f32 %v894_v24, %v2809_v7 }
 0x1cd   : > { %v925_v31 = vsel %vm766_vm5, %v912_v25, 0.0  ;;  %v918_v41 = vsel %vm766_vm5, %v911_v26, 0.0 }
 0x1ce   : > { %v926_v42 = vadd.f32 %v925_v31, %v924_v27  ;;  %v919_v47 = vadd.f32 %v918_v41, %v917_v28  ;;  %v957_v53 = vpop.permute.xlu1 %956  ;;  %v955_v54 = vpop.permute.xlu0 %954 }
 0x1cf   : > { %v979_v32 = vmul.f32 %v957_v53, %v2776_v51  ;;  %v978_v60 = vmul.f32 %v955_v54, %v2778_v52 }
 0x1d0   : > { %931 = vrot.lane.b32.xlu1 %v926_v42, %s2369_s29  ;;  %929 = vrot.lane.b32.xlu0 %v919_v47, %s2369_s29 }
 0x1d1   : > { %v993_v0 = vsel %vm766_vm5, %v979_v32, 0.0  ;;  %v986_v1 = vsel %vm766_vm5, %v978_v60, 0.0 }
 0x1d2   : > { %v961_v48 = vpop.permute.xlu1 %960  ;;  %v959_v59 = vpop.permute.xlu0 %958 }
 0x1d3   : > { %v981_v39 = vmul.f32 %v961_v48, %v2766_v35  ;;  %v980_v29 = vmul.f32 %v959_v59, %v2768_v36 }
 0x1d5   : > { %v994_v62 = vsel %vm766_vm5, %v981_v39, 0.0  ;;  %v987_v63 = vsel %vm766_vm5, %v980_v29, 0.0 }
 0x1d6   : > { %v965_v40 = vpop.permute.xlu1 %964  ;;  %v963_v30 = vpop.permute.xlu0 %962  ;;  %v995_v49 = vadd.f32 %v994_v62, %v993_v0  ;;  %v988_v6 = vadd.f32 %v987_v63, %v986_v1 }
 0x1d7   : > { %v983_v33 = vmul.f32 %v965_v40, %v2786_v55  ;;  %v982_v34 = vmul.f32 %v963_v30, %v2788_v56 }
 0x1d9   : > { %v996_v2 = vsel %vm766_vm5, %v983_v33, 0.0  ;;  %v989_v5 = vsel %vm766_vm5, %v982_v34, 0.0 }
 0x1da   : > { %v969_v50 = vpop.permute.xlu1 %968  ;;  %v967_v43 = vpop.permute.xlu0 %966  ;;  %v997_v37 = vadd.f32 %v996_v2, %v995_v49  ;;  %v990_v38 = vadd.f32 %v989_v5, %v988_v6 }
 0x1db   : > { %v985_v44 = vmul.f32 %v969_v50, %v2798_v61  ;;  %v984_v8 = vmul.f32 %v967_v43, %v2809_v7 }
 0x1dd   : > { %v998_v9 = vsel %vm766_vm5, %v985_v44, 0.0  ;;  %v991_v10 = vsel %vm766_vm5, %v984_v8, 0.0 }
 0x1de   : > { %v999_v3 = vadd.f32 %v998_v9, %v997_v37  ;;  %v992_v4 = vadd.f32 %v991_v10, %v990_v38  ;;  %v1030_v11 = vpop.permute.xlu1 %1029  ;;  %v1028_v12 = vpop.permute.xlu0 %1027 }
 0x1df   : > { %v1052_v15 = vmul.f32 %v1030_v11, %v2776_v51  ;;  %v1051_v16 = vmul.f32 %v1028_v12, %v2778_v52 }
 0x1e0   : > { %1004 = vrot.lane.b32.xlu1 %v999_v3, %s2369_s29  ;;  %1002 = vrot.lane.b32.xlu0 %v992_v4, %s2369_s29 }
 0x1e1   : > { %v1066_v21 = vsel %vm766_vm5, %v1052_v15, 0.0  ;;  %v1059_v22 = vsel %vm766_vm5, %v1051_v16, 0.0 }
 0x1e2   : > { %v1034_v57 = vpop.permute.xlu1 %1033  ;;  %v1032_v13 = vpop.permute.xlu0 %1031 }
 0x1e3   : > { %v1054_v58 = vmul.f32 %v1034_v57, %v2766_v35  ;;  %v1053_v14 = vmul.f32 %v1032_v13, %v2768_v36 }
 0x1e5   : > { %v1067_v45 = vsel %vm766_vm5, %v1054_v58, 0.0  ;;  %v1060_v17 = vsel %vm766_vm5, %v1053_v14, 0.0 }
 0x1e6   : > { %v1038_v19 = vpop.permute.xlu1 %1037  ;;  %v1036_v20 = vpop.permute.xlu0 %1035  ;;  %v1068_v25 = vadd.f32 %v1067_v45, %v1066_v21  ;;  %v1061_v26 = vadd.f32 %v1060_v17, %v1059_v22 }
 0x1e7   : > { %v1056_v18 = vmul.f32 %v1038_v19, %v2786_v55  ;;  %v1055_v46 = vmul.f32 %v1036_v20, %v2788_v56  ;;  %v3036_v19 = vld [vmem:[#allocation3 + $0x22] sm:$0xff]  ;;  %v3038_v20 = vld [vmem:[#allocation3 + $0x1a] sm:$0xff] }
 0x1e9   : > { %v1069_v23 = vsel %vm766_vm5, %v1056_v18, 0.0  ;;  %v1062_v24 = vsel %vm766_vm5, %v1055_v46, 0.0  ;;  %v3048_v18 = vld [vmem:[#allocation3 + $0x3a] sm:$0xff]  ;;  %v3050_v46 = vld [vmem:[#allocation3 + $0x32] sm:$0xff] }
 0x1ea   : > { %v1042_v27 = vpop.permute.xlu1 %1041  ;;  %v1040_v28 = vpop.permute.xlu0 %1039  ;;  %v1070_v42 = vadd.f32 %v1069_v23, %v1068_v25  ;;  %v1063_v47 = vadd.f32 %v1062_v24, %v1061_v26  ;;  %v3060_v23 = vld [vmem:[#allocation3 + $0x52] sm:$0xff]  ;;  %v3062_v24 = vld [vmem:[#allocation3 + $0x4a] sm:$0xff] }
 0x1eb   : > { %v1058_v31 = vmul.f32 %v1042_v27, %v2798_v61  ;;  %v1057_v41 = vmul.f32 %v1040_v28, %v2809_v7 }
 0x1ed   : > { %v1071_v53 = vsel %vm766_vm5, %v1058_v31, 0.0  ;;  %v1064_v54 = vsel %vm766_vm5, %v1057_v41, 0.0 }
 0x1ee   : > { %v1072_v48 = vadd.f32 %v1071_v53, %v1070_v42  ;;  %v1065_v59 = vadd.f32 %v1064_v54, %v1063_v47  ;;  %v1111_v39 = vpop.permute.xlu1 %1110  ;;  %v1109_v29 = vpop.permute.xlu0 %1108 }
 0x1ef   : > { %v1133_v62 = vmul.f32 %v1111_v39, %v2776_v51  ;;  %v1132_v63 = vmul.f32 %v1109_v29, %v2778_v52 }
 0x1f0   : > { %1077 = vrot.lane.b32.xlu1 %v1072_v48, %s2369_s29  ;;  %1075 = vrot.lane.b32.xlu0 %v1065_v59, %s2369_s29 }
 0x1f1   : > { %v1148_v49 = vsel %vm1140_vm6, %v1133_v62, 0.0  ;;  %v1141_v6 = vsel %vm1140_vm6, %v1132_v63, 0.0 }
 0x1f2   : > { %v1115_v32 = vpop.permute.xlu1 %1114  ;;  %v1113_v60 = vpop.permute.xlu0 %1112 }
 0x1f3   : > { %v1135_v40 = vmul.f32 %v1115_v32, %v2766_v35  ;;  %v1134_v30 = vmul.f32 %v1113_v60, %v2768_v36 }
 0x1f5   : > { %v1149_v0 = vsel %vm1140_vm6, %v1135_v40, 0.0  ;;  %v1142_v1 = vsel %vm1140_vm6, %v1134_v30, 0.0 }
 0x1f6   : > { %v1119_v33 = vpop.permute.xlu1 %1118  ;;  %v1117_v34 = vpop.permute.xlu0 %1116  ;;  %v1150_v44 = vadd.f32 %v1149_v0, %v1148_v49  ;;  %v1143_v8 = vadd.f32 %v1142_v1, %v1141_v6 }
 0x1f7   : > { %v1137_v2 = vmul.f32 %v1119_v33, %v2786_v55  ;;  %v1136_v5 = vmul.f32 %v1117_v34, %v2788_v56 }
 0x1f9   : > { %v1151_v50 = vsel %vm1140_vm6, %v1137_v2, 0.0  ;;  %v1144_v43 = vsel %vm1140_vm6, %v1136_v5, 0.0 }
 0x1fa   : > { %v1123_v37 = vpop.permute.xlu1 %1122  ;;  %v1121_v38 = vpop.permute.xlu0 %1120  ;;  %v1152_v3 = vadd.f32 %v1151_v50, %v1150_v44  ;;  %v1145_v4 = vadd.f32 %v1144_v43, %v1143_v8 }
 0x1fb   : > { %v1139_v9 = vmul.f32 %v1123_v37, %v2798_v61  ;;  %v1138_v10 = vmul.f32 %v1121_v38, %v2809_v7 }
 0x1fd   : > { %v1153_v11 = vsel %vm1140_vm6, %v1139_v9, 0.0  ;;  %v1146_v12 = vsel %vm1140_vm6, %v1138_v10, 0.0 }
 0x1fe   : > { %v1154_v57 = vadd.f32 %v1153_v11, %v1152_v3  ;;  %v1147_v13 = vadd.f32 %v1146_v12, %v1145_v4  ;;  %v3021_v58 = vpop.permute.xlu1 %1184  ;;  %v3023_v14 = vpop.permute.xlu0 %1182 }
 0x1ff   : > { %v1207_v33 = vmul.f32 %v3021_v58, %v2776_v51  ;;  %v1206_v34 = vmul.f32 %v3023_v14, %v2778_v52 }
 0x200   : > { %1159 = vrot.lane.b32.xlu1 %v1154_v57, %s2369_s29  ;;  %1157 = vrot.lane.b32.xlu0 %v1147_v13, %s2369_s29 }
 0x201   : > { %v1221_v50 = vsel %vm1140_vm6, %v1207_v33, 0.0  ;;  %v1214_v43 = vsel %vm1140_vm6, %v1206_v34, 0.0 }
 0x202   : > { %v412_v15 = vpop.permute.xlu1 %411  ;;  %v410_v16 = vpop.permute.xlu0 %409 }
 0x203   : > { %417 = vst.msk [vmem:[%s3030_s26 + $0x8] sm:$0xff] %vm415_vm7, %v412_v15  ;;  %416 = vst.msk [vmem:[%s3030_s26] sm:$0xff] %vm415_vm7, %v410_v16  ;;  %v3120_v15 = vld [vmem:[#allocation3 + $0xc] sm:$0xff]  ;;  %v3122_v16 = vld [vmem:[#allocation3 + $0x4] sm:$0xff] }
 0x204   : > { %1188 = vrot.lane.b32.xlu1 %v3036_v19, %s2367_s16  ;;  %1186 = vrot.lane.b32.xlu0 %v3038_v20, %s2367_s16 }
 0x206   : > { %v485_v45 = vpop.permute.xlu1 %484  ;;  %v483_v17 = vpop.permute.xlu0 %482 }
 0x207   : > { %2149 = vst.msk [vmem:[%s3030_s26 + $0x58] sm:$0xff] %vm415_vm7, %v485_v45  ;;  %2148 = vst.msk [vmem:[%s3030_s26 + $0x50] sm:$0xff] %vm415_vm7, %v483_v17  ;;  %v3128_v45 = vld [vmem:[#allocation3 + $0x24] sm:$0xff]  ;;  %v3130_v17 = vld [vmem:[#allocation3 + $0x1c] sm:$0xff] }
 0x208   : > { %1192 = vrot.lane.b32.xlu1 %v3048_v18, %s2367_s16  ;;  %1190 = vrot.lane.b32.xlu0 %v3050_v46, %s2367_s16 }
 0x20a   : > { %v558_v21 = vpop.permute.xlu1 %557  ;;  %v556_v22 = vpop.permute.xlu0 %555 }
 0x20b   : > { %2151 = vst.msk [vmem:[%s3030_s26 + $0xa8] sm:$0xff] %vm415_vm7, %v558_v21  ;;  %2150 = vst.msk [vmem:[%s3030_s26 + $0xa0] sm:$0xff] %vm415_vm7, %v556_v22  ;;  %v3136_v21 = vld [vmem:[#allocation3 + $0x3c] sm:$0xff]  ;;  %v3138_v22 = vld [vmem:[#allocation3 + $0x34] sm:$0xff] }
 0x20c   : > { %1196 = vrot.lane.b32.xlu1 %v3060_v23, %s2367_s16  ;;  %1194 = vrot.lane.b32.xlu0 %v3062_v24, %s2367_s16 }
 0x20e   : > { %v631_v25 = vpop.permute.xlu1 %630  ;;  %v629_v26 = vpop.permute.xlu0 %628 }
 0x20f   : > { %2153 = vst.msk [vmem:[%s3030_s26 + $0xf8] sm:$0xff] %vm415_vm7, %v631_v25  ;;  %2152 = vst.msk [vmem:[%s3030_s26 + $0xf0] sm:$0xff] %vm415_vm7, %v629_v26  ;;  %v3144_v25 = vld [vmem:[#allocation3 + $0x54] sm:$0xff]  ;;  %v3146_v26 = vld [vmem:[#allocation3 + $0x4c] sm:$0xff] }
 0x212   : > { %v704_v27 = vpop.permute.xlu1 %703  ;;  %v702_v28 = vpop.permute.xlu0 %701 }
 0x213   : > { %2155 = vst.msk [vmem:[%s3030_s26 + $0x148] sm:$0xff] %vm415_vm7, %v704_v27  ;;  %2154 = vst.msk [vmem:[%s3030_s26 + $0x140] sm:$0xff] %vm415_vm7, %v702_v28 }
 0x222   : > { %v786_v31 = vpop.permute.xlu1 %785  ;;  %v784_v41 = vpop.permute.xlu0 %783 }
 0x223   : > { %2157 = vst.msk [vmem:[%s3030_s26 + $0x18] sm:$0xff] %vm415_vm7, %v786_v31  ;;  %2156 = vst.msk [vmem:[%s3030_s26 + $0x10] sm:$0xff] %vm415_vm7, %v784_v41 }
 0x232   : > { %v859_v42 = vpop.permute.xlu1 %858  ;;  %v857_v47 = vpop.permute.xlu0 %856 }
 0x233   : > { %2159 = vst.msk [vmem:[%s3030_s26 + $0x68] sm:$0xff] %vm415_vm7, %v859_v42  ;;  %2158 = vst.msk [vmem:[%s3030_s26 + $0x60] sm:$0xff] %vm415_vm7, %v857_v47 }
 0x242   : > { %v932_v53 = vpop.permute.xlu1 %931  ;;  %v930_v54 = vpop.permute.xlu0 %929 }
 0x243   : > { %2161 = vst.msk [vmem:[%s3030_s26 + $0xb8] sm:$0xff] %vm415_vm7, %v932_v53  ;;  %2160 = vst.msk [vmem:[%s3030_s26 + $0xb0] sm:$0xff] %vm415_vm7, %v930_v54 }
 0x252   : > { %v1005_v48 = vpop.permute.xlu1 %1004  ;;  %v1003_v59 = vpop.permute.xlu0 %1002 }
 0x253   : > { %2163 = vst.msk [vmem:[%s3030_s26 + $0x108] sm:$0xff] %vm415_vm7, %v1005_v48  ;;  %2162 = vst.msk [vmem:[%s3030_s26 + $0x100] sm:$0xff] %vm415_vm7, %v1003_v59 }
 0x262   : > { %v1078_v39 = vpop.permute.xlu1 %1077  ;;  %v1076_v29 = vpop.permute.xlu0 %1075 }
 0x263   : > { %2165 = vst.msk [vmem:[%s3030_s26 + $0x158] sm:$0xff] %vm415_vm7, %v1078_v39  ;;  %2164 = vst.msk [vmem:[%s3030_s26 + $0x150] sm:$0xff] %vm415_vm7, %v1076_v29 }
 0x272   : > { %v1160_v32 = vpop.permute.xlu1 %1159  ;;  %v1158_v60 = vpop.permute.xlu0 %1157 }
 0x273   : > { %2167 = vst.msk [vmem:[%s3030_s26 + $0x28] sm:$0xff] %vm415_vm7, %v1160_v32  ;;  %2166 = vst.msk [vmem:[%s3030_s26 + $0x20] sm:$0xff] %vm415_vm7, %v1158_v60 }
 0x276   : > { %v1189_v40 = vpop.permute.xlu1 %1188  ;;  %v1187_v30 = vpop.permute.xlu0 %1186 }
 0x277   : > { %v1209_v62 = vmul.f32 %v1189_v40, %v2766_v35  ;;  %v1208_v63 = vmul.f32 %v1187_v30, %v2768_v36 }
 0x279   : > { %v1222_v2 = vsel %vm1140_vm6, %v1209_v62, 0.0  ;;  %v1215_v5 = vsel %vm1140_vm6, %v1208_v63, 0.0 }
 0x27a   : > { %v1193_v0 = vpop.permute.xlu1 %1192  ;;  %v1191_v1 = vpop.permute.xlu0 %1190  ;;  %v1223_v37 = vadd.f32 %v1222_v2, %v1221_v50  ;;  %v1216_v38 = vadd.f32 %v1215_v5, %v1214_v43  ;;  %v3174_v50 = vld [vmem:[#allocation3 + $0xe] sm:$0xff]  ;;  %v3176_v43 = vld [vmem:[#allocation3 + $0x6] sm:$0xff] }
 0x27b   : > { %v1211_v49 = vmul.f32 %v1193_v0, %v2786_v55  ;;  %v1210_v6 = vmul.f32 %v1191_v1, %v2788_v56 }
 0x27d   : > { %v1224_v44 = vsel %vm1140_vm6, %v1211_v49, 0.0  ;;  %v1217_v8 = vsel %vm1140_vm6, %v1210_v6, 0.0 }
 0x27e   : > { %v1197_v9 = vpop.permute.xlu1 %1196  ;;  %v1195_v10 = vpop.permute.xlu0 %1194  ;;  %v1225_v11 = vadd.f32 %v1224_v44, %v1223_v37  ;;  %v1218_v12 = vadd.f32 %v1217_v8, %v1216_v38  ;;  %v3184_v44 = vld [vmem:[#allocation3 + $0x1e] sm:$0xff]  ;;  %v3192_v37 = vld [vmem:[#allocation3 + $0x36] sm:$0xff] }
 0x27f   : > { %v1213_v3 = vmul.f32 %v1197_v9, %v2798_v61  ;;  %v1212_v4 = vmul.f32 %v1195_v10, %v2809_v7  ;;  %v3190_v8 = vld [vmem:[#allocation3 + $0x3e] sm:$0xff]  ;;  %3818 = vst [vmem:[#allocation10_spill] sm:$0xff] %v3192_v37  ;;  %v3198_v38 = vld [vmem:[#allocation3 + $0x56] sm:$0xff]  ;;  %v3200_v9 = vld [vmem:[#allocation3 + $0x4e] sm:$0xff] }
 0x280   : > { %3819 = vst [vmem:[#allocation11_spill] sm:$0xff] %v3198_v38  ;;  %3820 = vst [vmem:[#allocation12_spill] sm:$0xff] %v3200_v9 }
 0x281   : > { %v1226_v57 = vsel %vm1140_vm6, %v1213_v3, 0.0  ;;  %v1219_v13 = vsel %vm1140_vm6, %v1212_v4, 0.0 }
 0x282   : > { %v1227_v58 = vadd.f32 %v1226_v57, %v1225_v11  ;;  %v1220_v14 = vadd.f32 %v1219_v13, %v1218_v12  ;;  %v3210_v13 = vld [vmem:[#allocation2 + $0x24] sm:$0xff] }
 0x284   : > { %1232 = vrot.lane.b32.xlu1 %v1227_v58, %s2369_s29  ;;  %1230 = vrot.lane.b32.xlu0 %v1220_v14, %s2369_s29  ;;  %v3213_v14 = vld [vmem:[#allocation2 + $0x1c] sm:$0xff] }
 0x288   : > { %1257 = vrot.lane.b32.xlu1 %v3120_v15, %s2367_s16  ;;  %1255 = vrot.lane.b32.xlu0 %v3122_v16, %s2367_s16 }
 0x28c   : > { %1261 = vrot.lane.b32.xlu1 %v3128_v45, %s2367_s16  ;;  %1259 = vrot.lane.b32.xlu0 %v3130_v17, %s2367_s16 }
 0x290   : > { %1265 = vrot.lane.b32.xlu1 %v3136_v21, %s2367_s16  ;;  %1263 = vrot.lane.b32.xlu0 %v3138_v22, %s2367_s16 }
 0x294   : > { %1269 = vrot.lane.b32.xlu1 %v3144_v25, %s2367_s16  ;;  %1267 = vrot.lane.b32.xlu0 %v3146_v26, %s2367_s16 }
 0x2f6   : > { %v1233_v27 = vpop.permute.xlu1 %1232  ;;  %v1231_v28 = vpop.permute.xlu0 %1230 }
 0x2f7   : > { %2169 = vst.msk [vmem:[%s3030_s26 + $0x78] sm:$0xff] %vm415_vm7, %v1233_v27  ;;  %2168 = vst.msk [vmem:[%s3030_s26 + $0x70] sm:$0xff] %vm415_vm7, %v1231_v28  ;;  %v3216_v28 = vld [vmem:[#allocation2 + $0xc] sm:$0xff] }
 0x2fa   : > { %v1258_v31 = vpop.permute.xlu1 %1257  ;;  %v1256_v41 = vpop.permute.xlu0 %1255 }
 0x2fb   : > { %v1280_v48 = vmul.f32 %v1258_v31, %v2776_v51  ;;  %v1279_v59 = vmul.f32 %v1256_v41, %v2778_v52  ;;  %v3219_v41 = vld [vmem:[#allocation2 + $0x4] sm:$0xff] }
 0x2fd   : > { %v1294_v62 = vsel %vm1140_vm6, %v1280_v48, 0.0 }
 0x2fe   : > { %v1262_v42 = vpop.permute.xlu1 %1261  ;;  %v1260_v47 = vpop.permute.xlu0 %1259 }
 0x2ff   : > { %v1282_v53 = vmul.f32 %v1262_v42, %v2766_v35  ;;  %v1281_v54 = vmul.f32 %v1260_v47, %v2768_v36  ;;  %v1287_v35 = vsel %vm1140_vm6, %v1279_v59, 0.0  ;;  %v3224_v59 = vld [vmem:[#allocation2 + $0x3c] sm:$0xff] }
 0x301   : > { %v1295_v32 = vsel %vm1140_vm6, %v1282_v53, 0.0  ;;  %v1288_v60 = vsel %vm1140_vm6, %v1281_v54, 0.0 }
 0x302   : > { %v1266_v39 = vpop.permute.xlu1 %1265  ;;  %v1264_v29 = vpop.permute.xlu0 %1263  ;;  %v1296_v63 = vadd.f32 %v1295_v32, %v1294_v62  ;;  %v1289_v52 = vadd.f32 %v1288_v60, %v1287_v35 }
 0x303   : > { %v1284_v40 = vmul.f32 %v1266_v39, %v2786_v55  ;;  %v1283_v30 = vmul.f32 %v1264_v29, %v2788_v56  ;;  %v3227_v29 = vld [vmem:[#allocation2 + $0x34] sm:$0xff] }
 0x305   : > { %v1297_v36 = vsel %vm1140_vm6, %v1284_v40, 0.0  ;;  %v1290_v51 = vsel %vm1140_vm6, %v1283_v30, 0.0 }
 0x306   : > { %v1270_v33 = vpop.permute.xlu1 %1269  ;;  %v1268_v34 = vpop.permute.xlu0 %1267  ;;  %v1298_v2 = vadd.f32 %v1297_v36, %v1296_v63  ;;  %v1291_v55 = vadd.f32 %v1290_v51, %v1289_v52  ;;  %v3234_v52 = vld [vmem:[#allocation2 + $0x54] sm:$0xff] }
 0x307   : > { %v1286_v0 = vmul.f32 %v1270_v33, %v2798_v61  ;;  %v1285_v1 = vmul.f32 %v1268_v34, %v2809_v7  ;;  %v3182_v61 = vld [vmem:[#allocation3 + $0x26] sm:$0xff] }
 0x309   : > { %v1299_v56 = vsel %vm1140_vm6, %v1286_v0, 0.0  ;;  %v1292_v5 = vsel %vm1140_vm6, %v1285_v1, 0.0 }
 0x30a   : > { %v1300_v49 = vadd.f32 %v1299_v56, %v1298_v2  ;;  %v1293_v6 = vadd.f32 %v1292_v5, %v1291_v55 }
 0x30c   : > { %1305 = vrot.lane.b32.xlu1 %v1300_v49, %s2369_s29  ;;  %1303 = vrot.lane.b32.xlu0 %v1293_v6, %s2369_s29  ;;  %v3242_v49 = vld [vmem:[#allocation3 + $0x10] sm:$0xff]  ;;  %v3244_v6 = vld [vmem:[#allocation3 + $0x8] sm:$0xff] }
 0x30d   : > { %3821 = vst [vmem:[#allocation13_spill] sm:$0xff] %v3242_v49  ;;  %3822 = vst [vmem:[#allocation14_spill] sm:$0xff] %v3244_v6 }
 0x310   : > { %1330 = vrot.lane.b32.xlu1 %v3174_v50, %s2367_s16  ;;  %1328 = vrot.lane.b32.xlu0 %v3176_v43, %s2367_s16 }
 0x314   : > { %1334 = vrot.lane.b32.xlu1 %v3182_v61, %s2367_s16  ;;  %1332 = vrot.lane.b32.xlu0 %v3184_v44, %s2367_s16 }
 0x318   : > { %1338 = vrot.lane.b32.xlu1 %v3190_v8, %s2367_s16  ;;  %1336 = vrot.lane.b32.xlu0 %v3192_v37, %s2367_s16 }
 0x31c   : > { %1342 = vrot.lane.b32.xlu1 %v3198_v38, %s2367_s16  ;;  %1340 = vrot.lane.b32.xlu0 %v3200_v9, %s2367_s16 }
 0x37e   : > { %v1306_v10 = vpop.permute.xlu1 %1305  ;;  %v1304_v3 = vpop.permute.xlu0 %1303 }
 0x37f   : > { %2171 = vst.msk [vmem:[%s3030_s26 + $0xc8] sm:$0xff] %vm415_vm7, %v1306_v10  ;;  %2170 = vst.msk [vmem:[%s3030_s26 + $0xc0] sm:$0xff] %vm415_vm7, %v1304_v3  ;;  %v3252_v10 = vld [vmem:[#allocation3 + $0x20] sm:$0xff] }
 0x380   : > { %3824 = vst [vmem:[#allocation16_spill] sm:$0xff] %v3252_v10  ;;  %v3258_v3 = vld [vmem:[#allocation3 + $0x40] sm:$0xff] }
 0x381   : > { %3825 = vst [vmem:[#allocation17_spill] sm:$0xff] %v3258_v3 }
 0x382   : > { %v1331_v4 = vpop.permute.xlu1 %1330  ;;  %v1329_v11 = vpop.permute.xlu0 %1328 }
 0x383   : > { %v1353_v31 = vmul.f32 %v3216_v28, %v1331_v4  ;;  %v1352_v42 = vmul.f32 %v3219_v41, %v1329_v11  ;;  %v3260_v4 = vld [vmem:[#allocation3 + $0x38] sm:$0xff] }
 0x384   : > { %3826 = vst [vmem:[#allocation18_spill] sm:$0xff] %v3260_v4  ;;  %v3266_v11 = vld [vmem:[#allocation3 + $0x58] sm:$0xff] }
 0x385   : > { %v1367_v60 = vsel %vm1140_vm6, %v1353_v31, 0.0  ;;  %v1360_v40 = vsel %vm1140_vm6, %v1352_v42, 0.0  ;;  %3827 = vst [vmem:[#allocation19_spill] sm:$0xff] %v3266_v11  ;;  %v3288_v31 = vld [vmem:[#allocation3 + $0x2] sm:$0xff] }
 0x386   : > { %v1335_v12 = vpop.permute.xlu1 %1334  ;;  %v1333_v57 = vpop.permute.xlu0 %1332 }
 0x387   : > { %v1355_v58 = vmul.f32 %v3210_v13, %v1335_v12  ;;  %v1354_v27 = vmul.f32 %v3213_v14, %v1333_v57  ;;  %v3268_v12 = vld [vmem:[#allocation3 + $0x50] sm:$0xff]  ;;  %v3274_v57 = vld [vmem:[#allocation3] sm:$0xff] }
 0x388   : > { %3828 = vst [vmem:[#allocation20_spill] sm:$0xff] %v3268_v12 }
 0x389   : > { %v1368_v54 = vsel %vm1140_vm6, %v1355_v58, 0.0  ;;  %v1361_v48 = vsel %vm1140_vm6, %v1354_v27, 0.0  ;;  %v3280_v58 = vld [vmem:[#allocation3 + $0x18] sm:$0xff]  ;;  %v3286_v27 = vld [vmem:[#allocation3 + $0xa] sm:$0xff] }
 0x38a   : > { %v1339_v47 = vpop.permute.xlu1 %1338  ;;  %v1337_v53 = vpop.permute.xlu0 %1336  ;;  %v1369_v35 = vadd.f32 %v1368_v54, %v1367_v60  ;;  %v1362_v36 = vadd.f32 %v1361_v48, %v1360_v40 }
 0x38b   : > { %v1357_v39 = vmul.f32 %v3224_v59, %v1339_v47  ;;  %v1356_v32 = vmul.f32 %v3227_v29, %v1337_v53 }
 0x38d   : > { %v1370_v30 = vsel %vm1140_vm6, %v1357_v39, 0.0  ;;  %v1363_v62 = vsel %vm1140_vm6, %v1356_v32, 0.0 }
 0x38e   : > { %v1343_v51 = vpop.permute.xlu1 %1342  ;;  %v1341_v63 = vpop.permute.xlu0 %1340  ;;  %v1371_v0 = vadd.f32 %v1370_v30, %v1369_v35  ;;  %v1364_v1 = vadd.f32 %v1363_v62, %v1362_v36 }
 0x38f   : > { %v1359_v33 = vmul.f32 %v3234_v52, %v1343_v51  ;;  %v1358_v34 = vmul.f32 %v1341_v63, %v2809_v7  ;;  %v3250_v7 = vld [vmem:[#allocation3 + $0x28] sm:$0xff] }
 0x390   : > { %3823 = vst [vmem:[#allocation15_spill] sm:$0xff] %v3250_v7 }
 0x391   : > { %v1372_v2 = vsel %vm1140_vm6, %v1359_v33, 0.0  ;;  %v1365_v55 = vsel %vm1140_vm6, %v1358_v34, 0.0 }
 0x392   : > { %v1373_v56 = vadd.f32 %v1372_v2, %v1371_v0  ;;  %v1366_v5 = vadd.f32 %v1365_v55, %v1364_v1  ;;  %v2260_v1 = vld [vmem:[#allocation2 + $0x4c] sm:$0xff] }
 0x394   : > { %1378 = vrot.lane.b32.xlu1 %v1373_v56, %s2369_s29  ;;  %1376 = vrot.lane.b32.xlu0 %v1366_v5, %s2369_s29 }
 0x398   : > { %1403 = vrot.lane.b32.xlu1 %v3242_v49, %s2367_s16  ;;  %1401 = vrot.lane.b32.xlu0 %v3244_v6, %s2367_s16 }
 0x39c   : > { %1407 = vrot.lane.b32.xlu1 %v3250_v7, %s2367_s16  ;;  %1405 = vrot.lane.b32.xlu0 %v3252_v10, %s2367_s16 }
 0x3a0   : > { %1411 = vrot.lane.b32.xlu1 %v3258_v3, %s2367_s16  ;;  %1409 = vrot.lane.b32.xlu0 %v3260_v4, %s2367_s16 }
 0x3a4   : > { %1415 = vrot.lane.b32.xlu1 %v3266_v11, %s2367_s16  ;;  %1413 = vrot.lane.b32.xlu0 %v3268_v12, %s2367_s16 }
 0x3a8   : > { %1484 = vrot.lane.b32.xlu1 %v3244_v6, %s2370_s13  ;;  %1482 = vrot.lane.b32.xlu0 %v3274_v57, %s2370_s13 }
 0x3ac   : > { %1488 = vrot.lane.b32.xlu1 %v3252_v10, %s2370_s13  ;;  %1486 = vrot.lane.b32.xlu0 %v3280_v58, %s2370_s13 }
 0x3b0   : > { %1558 = vrot.lane.b32.xlu1 %v3286_v27, %s2370_s13  ;;  %1556 = vrot.lane.b32.xlu0 %v3288_v31, %s2370_s13 }
 0x3b4   : > { %1562 = vrot.lane.b32.xlu1 %v3036_v19, %s2370_s13  ;;  %1560 = vrot.lane.b32.xlu0 %v3038_v20, %s2370_s13  ;;  %v3322_v19 = vld [vmem:[#allocation3 + $0x30] sm:$0xff]  ;;  %v3344_v20 = vld [vmem:[#allocation3 + $0x48] sm:$0xff] }
 0x3b8   : > { %1631 = vrot.lane.b32.xlu1 %v3120_v15, %s2370_s13  ;;  %1629 = vrot.lane.b32.xlu0 %v3122_v16, %s2370_s13 }
 0x3bc   : > { %1635 = vrot.lane.b32.xlu1 %v3128_v45, %s2370_s13  ;;  %1633 = vrot.lane.b32.xlu0 %v3130_v17, %s2370_s13 }
 0x3c0   : > { %1704 = vrot.lane.b32.xlu1 %v3174_v50, %s2370_s13  ;;  %1702 = vrot.lane.b32.xlu0 %v3176_v43, %s2370_s13 }
 0x3c4   : > { %1708 = vrot.lane.b32.xlu1 %v3182_v61, %s2370_s13  ;;  %1706 = vrot.lane.b32.xlu0 %v3184_v44, %s2370_s13 }
 0x3c8   : > { %1777 = vrot.lane.b32.xlu1 %v3242_v49, %s2370_s13  ;;  %1775 = vrot.lane.b32.xlu0 %v3244_v6, %s2370_s13  ;;  %v3451_v49 = vld [vmem:[#allocation2 + $0x34] sm:$0xff] }
 0x3cc   : > { %1781 = vrot.lane.b32.xlu1 %v3250_v7, %s2370_s13  ;;  %1779 = vrot.lane.b32.xlu0 %v3252_v10, %s2370_s13 }
 0x3d0   : > { %1492 = vrot.lane.b32.xlu1 %v3260_v4, %s2370_s13  ;;  %1490 = vrot.lane.b32.xlu0 %v3322_v19, %s2370_s13 }
 0x3d4   : > { %1566 = vrot.lane.b32.xlu1 %v3048_v18, %s2370_s13  ;;  %1564 = vrot.lane.b32.xlu0 %v3050_v46, %s2370_s13 }
 0x3d8   : > { %1639 = vrot.lane.b32.xlu1 %v3136_v21, %s2370_s13  ;;  %1637 = vrot.lane.b32.xlu0 %v3138_v22, %s2370_s13 }
 0x3dc   : > { %1712 = vrot.lane.b32.xlu1 %v3190_v8, %s2370_s13  ;;  %1710 = vrot.lane.b32.xlu0 %v3192_v37, %s2370_s13  ;;  %v3471_v37 = vmul.f32 %v3451_v49, %v3138_v22 }
 0x3e0   : > { %1785 = vrot.lane.b32.xlu1 %v3258_v3, %s2370_s13  ;;  %1783 = vrot.lane.b32.xlu0 %v3260_v4, %s2370_s13 }
 0x3e4   : > { %1496 = vrot.lane.b32.xlu1 %v3268_v12, %s2370_s13  ;;  %1494 = vrot.lane.b32.xlu0 %v3344_v20, %s2370_s13 }
 0x3e8   : > { %1570 = vrot.lane.b32.xlu1 %v3060_v23, %s2370_s13  ;;  %1568 = vrot.lane.b32.xlu0 %v3062_v24, %s2370_s13 }
 0x3ec   : > { %1643 = vrot.lane.b32.xlu1 %v3144_v25, %s2370_s13  ;;  %1641 = vrot.lane.b32.xlu0 %v3146_v26, %s2370_s13 }
 0x3f0   : > { %1716 = vrot.lane.b32.xlu1 %v3198_v38, %s2370_s13  ;;  %1714 = vrot.lane.b32.xlu0 %v3200_v9, %s2370_s13 }
 0x3f4   : > { %1789 = vrot.lane.b32.xlu1 %v3266_v11, %s2370_s13  ;;  %1787 = vrot.lane.b32.xlu0 %v3268_v12, %s2370_s13 }
 0x406   : > { %v1379_v18 = vpop.permute.xlu1 %1378  ;;  %v1377_v46 = vpop.permute.xlu0 %1376 }
 0x407   : > { %2173 = vst.msk [vmem:[%s3030_s26 + $0x118] sm:$0xff] %vm415_vm7, %v1379_v18  ;;  %2172 = vst.msk [vmem:[%s3030_s26 + $0x110] sm:$0xff] %vm415_vm7, %v1377_v46 }
 0x40a   : > { %v1404_v24 = vpop.permute.xlu1 %1403  ;;  %v1402_v42 = vpop.permute.xlu0 %1401 }
 0x40b   : > { %v1426_v39 = vmul.f32 %v3216_v28, %v1404_v24  ;;  %v1425_v32 = vmul.f32 %v3219_v41, %v1402_v42 }
 0x40d   : > { %v1440_v51 = vsel %vm1140_vm6, %v1426_v39, 0.0 }
 0x40e   : > { %v1408_v47 = vpop.permute.xlu1 %1407  ;;  %v1406_v53 = vpop.permute.xlu0 %1405 }
 0x40f   : > { %v1428_v54 = vmul.f32 %v3210_v13, %v1408_v47  ;;  %v1427_v48 = vmul.f32 %v3213_v14, %v1406_v53  ;;  %v1433_v13 = vsel %vm1140_vm6, %v1425_v32, 0.0 }
 0x411   : > { %v1441_v30 = vsel %vm1140_vm6, %v1428_v54, 0.0  ;;  %v1434_v62 = vsel %vm1140_vm6, %v1427_v48, 0.0 }
 0x412   : > { %v1412_v60 = vpop.permute.xlu1 %1411  ;;  %v1410_v40 = vpop.permute.xlu0 %1409  ;;  %v1442_v63 = vadd.f32 %v1441_v30, %v1440_v51  ;;  %v1435_v41 = vadd.f32 %v1434_v62, %v1433_v13 }
 0x413   : > { %v1430_v35 = vmul.f32 %v3224_v59, %v1412_v60  ;;  %v1429_v36 = vmul.f32 %v3227_v29, %v1410_v40 }
 0x415   : > { %v1443_v14 = vsel %vm1140_vm6, %v1430_v35, 0.0  ;;  %v1436_v28 = vsel %vm1140_vm6, %v1429_v36, 0.0 }
 0x416   : > { %v1416_v33 = vpop.permute.xlu1 %1415  ;;  %v1414_v34 = vpop.permute.xlu0 %1413  ;;  %v1444_v55 = vadd.f32 %v1443_v14, %v1442_v63  ;;  %v1437_v59 = vadd.f32 %v1436_v28, %v1435_v41  ;;  %v3419_v63 = vld [vmem:[#allocation2 + $0x24] sm:$0xff]  ;;  %v3421_v41 = vld [vmem:[#allocation2 + $0x1c] sm:$0xff] }
 0x417   : > { %v1432_v0 = vmul.f32 %v3234_v52, %v1416_v33  ;;  %v1431_v2 = vmul.f32 %v2260_v1, %v1414_v34  ;;  %v1933_v33 = vmul.f32 %v3419_v63, %v3128_v45  ;;  %v1932_v34 = vmul.f32 %v3421_v41, %v3130_v17  ;;  %v3429_v1 = vld [vmem:[#allocation2 + $0x4] sm:$0xff] }
 0x419   : > { %v1445_v29 = vsel %vm1140_vm6, %v1432_v0, 0.0  ;;  %v1438_v56 = vsel %vm1140_vm6, %v1431_v2, 0.0  ;;  %v3427_v0 = vld [vmem:[#allocation2 + $0xc] sm:$0xff]  ;;  %v1939_v11 = vsel %vm217_vm1, %v1932_v34, 0.0 }
 0x41a   : > { %v1446_v5 = vadd.f32 %v1445_v29, %v1444_v55  ;;  %v1439_v18 = vadd.f32 %v1438_v56, %v1437_v59  ;;  %v3385_v46 = vpop.permute.xlu1 %1484  ;;  %v3387_v24 = vpop.permute.xlu0 %1482  ;;  %v1931_v59 = vmul.f32 %v3427_v0, %v3120_v15  ;;  %v1930_v29 = vmul.f32 %v3429_v1, %v3122_v16  ;;  %v3435_v56 = vld [vmem:[#allocation2 + $0x3c] sm:$0xff]  ;;  %v3461_v34 = vld [vmem:[#allocation2 + $0x4c] sm:$0xff] }
 0x41b   : > { %v1935_v17 = vmul.f32 %v3435_v56, %v3136_v21  ;;  %v1851_v16 = vmul.f32 %v3419_v63, %v3252_v10  ;;  %v1849_v7 = vmul.f32 %v3427_v0, %v3244_v6 }
 0x41c   : > { %1451 = vrot.lane.b32.xlu1 %v1446_v5, %s2369_s29  ;;  %1449 = vrot.lane.b32.xlu0 %v1439_v18, %s2369_s29  ;;  %v3437_v5 = vld [vmem:[#allocation2 + $0x54] sm:$0xff]  ;;  %v1946_v18 = vsel %vm217_vm1, %v1933_v33, 0.0  ;;  %v1938_v21 = vsel %vm217_vm1, %v1930_v29, 0.0  ;;  %v3459_v33 = vmul.f32 %v3427_v0, %v3174_v50 }
 0x41d   : > { %v1896_v45 = vmul.f32 %v3437_v5, %v3060_v23  ;;  %v1945_v23 = vsel %vm217_vm1, %v1931_v59, 0.0  ;;  %v3465_v9 = vmul.f32 %v3437_v5, %v3144_v25  ;;  %v3473_v6 = vadd.f32 %v1939_v11, %v1938_v21 }
 0x41e   : > { %v1489_v42 = vpop.permute.xlu1 %1488  ;;  %v1487_v52 = vpop.permute.xlu0 %1486  ;;  %v3467_v10 = vadd.f32 %v1946_v18, %v1945_v23  ;;  %v1853_v59 = vmul.f32 %v3435_v56, %v3260_v4  ;;  %v3481_v29 = vsel %vm217_vm1, %v1935_v17, 0.0  ;;  %v3485_v25 = vmul.f32 %v3461_v34, %v3146_v26 }
 0x41f   : > { %3829 = vst [vmem:[#allocation21_spill] sm:$0xff] %v3473_v6  ;;  %v3478_v50 = vsel %vm217_vm1, %v1896_v45, 0.0  ;;  %v1509_v18 = vmul.f32 %v1489_v42, %v3419_v63  ;;  %v1508_v22 = vmul.f32 %v1487_v52, %v3421_v41  ;;  %v1864_v21 = vsel %vm217_vm1, %v1851_v16, 0.0 }
 0x420   : > { %3830 = vst [vmem:[#allocation22_spill] sm:$0xff] %v3478_v50  ;;  %3831 = vst [vmem:[#allocation23_spill] sm:$0xff] %v3485_v25  ;;  %v3496_v45 = vmul.f32 %v3419_v63, %v3182_v61  ;;  %v3500_v17 = vmul.f32 %v3437_v5, %v3268_v12  ;;  %v1863_v26 = vsel %vm217_vm1, %v1849_v7, 0.0  ;;  %v1848_v42 = vmul.f32 %v3274_v57, %v3429_v1 }
 0x421   : > { %v1850_v52 = vmul.f32 %v3280_v58, %v3421_v41  ;;  %v1507_v4 = vmul.f32 %v3385_v46, %v3427_v0  ;;  %v1506_v16 = vmul.f32 %v3387_v24, %v3429_v1  ;;  %v3513_v12 = vadd.f32 %v1864_v21, %v1863_v26 }
 0x422   : > { %v3391_v47 = vpop.permute.xlu1 %1558  ;;  %v3393_v53 = vpop.permute.xlu0 %1556  ;;  %3832 = vst [vmem:[#allocation24_spill] sm:$0xff] %v3496_v45  ;;  %v3516_v7 = vsel %vm217_vm1, %v1853_v59, 0.0  ;;  %v3520_v57 = vmul.f32 %v3286_v27, %v3427_v0  ;;  %v1523_v58 = vsel %vm1514_vm8, %v1509_v18, 0.0  ;;  %v1516_v46 = vsel %vm1514_vm8, %v1508_v22, 0.0 }
 0x423   : > { %v1581_v27 = vmul.f32 %v3391_v47, %v3427_v0  ;;  %v1580_v59 = vmul.f32 %v3393_v53, %v3429_v1  ;;  %v1522_v21 = vsel %vm1514_vm8, %v1507_v4, 0.0 }
 0x424   : > { %v1524_v25 = vadd.f32 %v1523_v58, %v1522_v21 }
 0x426   : > { %v1563_v54 = vpop.permute.xlu1 %1562  ;;  %v1561_v48 = vpop.permute.xlu0 %1560 }
 0x427   : > { %v1583_v61 = vmul.f32 %v1563_v54, %v3419_v63  ;;  %v1582_v45 = vmul.f32 %v1561_v48, %v3421_v41  ;;  %v3530_v54 = vmul.f32 %v3322_v19, %v3451_v49  ;;  %v3534_v48 = vmul.f32 %v3344_v20, %v3461_v34 }
 0x428   : > { %v1515_v19 = vsel %vm1514_vm8, %v1506_v16, 0.0  ;;  %v3559_v16 = vsel %vm217_vm1, %v1848_v42, 0.0 }
 0x429   : > { %v1596_v26 = vsel %vm1514_vm8, %v1583_v61, 0.0  ;;  %v1589_v20 = vsel %vm1514_vm8, %v1582_v45, 0.0  ;;  %v3562_v45 = vsel %vm217_vm1, %v1850_v52, 0.0 }
 0x42a   : > { %v3395_v39 = vpop.permute.xlu1 %1631  ;;  %v3397_v32 = vpop.permute.xlu0 %1629 }
 0x42b   : > { %v1654_v47 = vmul.f32 %v3395_v39, %v3427_v0  ;;  %v1653_v53 = vmul.f32 %v3397_v32, %v3429_v1  ;;  %v1595_v39 = vsel %vm1514_vm8, %v1581_v27, 0.0  ;;  %v1588_v32 = vsel %vm1514_vm8, %v1580_v59, 0.0 }
 0x42c   : > { %v1597_v61 = vadd.f32 %v1596_v26, %v1595_v39  ;;  %v1590_v58 = vadd.f32 %v1589_v20, %v1588_v32 }
 0x42d   : > { %v1668_v21 = vsel %vm1514_vm8, %v1654_v47, 0.0  ;;  %v1661_v52 = vsel %vm1514_vm8, %v1653_v53, 0.0 }
 0x42e   : > { %v3399_v60 = vpop.permute.xlu1 %1635  ;;  %v3401_v40 = vpop.permute.xlu0 %1633 }
 0x42f   : > { %v1656_v18 = vmul.f32 %v3399_v60, %v3419_v63  ;;  %v1655_v22 = vmul.f32 %v3401_v40, %v3421_v41  ;;  %v1517_v40 = vadd.f32 %v1516_v46, %v1515_v19 }
 0x432   : > { %v3403_v30 = vpop.permute.xlu1 %1704  ;;  %v3405_v62 = vpop.permute.xlu0 %1702 }
 0x433   : > { %v1726_v26 = vmul.f32 %v3405_v62, %v3429_v1 }
 0x436   : > { %v3407_v35 = vpop.permute.xlu1 %1708  ;;  %v3409_v36 = vpop.permute.xlu0 %1706 }
 0x437   : > { %v1728_v47 = vmul.f32 %v3409_v36, %v3421_v41 }
 0x43a   : > { %v3411_v51 = vpop.permute.xlu1 %1777  ;;  %v3413_v13 = vpop.permute.xlu0 %1775 }
 0x43e   : > { %v3415_v14 = vpop.permute.xlu1 %1781  ;;  %v3417_v28 = vpop.permute.xlu0 %1779 }
 0x442   : > { %v1493_v2 = vpop.permute.xlu1 %1492  ;;  %v1491_v55 = vpop.permute.xlu0 %1490 }
 0x443   : > { %v1511_v38 = vmul.f32 %v1493_v2, %v3435_v56  ;;  %v1510_v60 = vmul.f32 %v1491_v55, %v3451_v49  ;;  %v1669_v2 = vsel %vm1514_vm8, %v1656_v18, 0.0  ;;  %v1662_v55 = vsel %vm1514_vm8, %v1655_v22, 0.0 }
 0x444   : > { %v1670_v19 = vadd.f32 %v1669_v2, %v1668_v21  ;;  %v1663_v18 = vadd.f32 %v1662_v55, %v1661_v52  ;;  %v1727_v22 = vmul.f32 %v3403_v30, %v3427_v0  ;;  %v1734_v21 = vsel %vm1514_vm8, %v1726_v26, 0.0 }
 0x445   : > { %v1525_v27 = vsel %vm1514_vm8, %v1511_v38, 0.0  ;;  %v1518_v59 = vsel %vm1514_vm8, %v1510_v60, 0.0 }
 0x446   : > { %v3445_v3 = vpop.permute.xlu1 %1566  ;;  %v3447_v15 = vpop.permute.xlu0 %1564  ;;  %v1526_v60 = vadd.f32 %v1525_v27, %v1524_v25  ;;  %v1519_v39 = vadd.f32 %v1518_v59, %v1517_v40  ;;  %v1741_v55 = vsel %vm1514_vm8, %v1727_v22, 0.0 }
 0x447   : > { %v1585_v46 = vmul.f32 %v3445_v3, %v3435_v56  ;;  %v1584_v42 = vmul.f32 %v3447_v15, %v3451_v49  ;;  %v1729_v15 = vmul.f32 %v3407_v35, %v3419_v63 }
 0x449   : > { %v1598_v32 = vsel %vm1514_vm8, %v1585_v46, 0.0  ;;  %v1591_v30 = vsel %vm1514_vm8, %v1584_v42, 0.0  ;;  %v1742_v42 = vsel %vm1514_vm8, %v1729_v15, 0.0 }
 0x44a   : > { %v3489_v23 = vpop.permute.xlu1 %1639  ;;  %v3491_v11 = vpop.permute.xlu0 %1637  ;;  %v1599_v27 = vadd.f32 %v1598_v32, %v1597_v61  ;;  %v1801_v32 = vmul.f32 %v3417_v28, %v3421_v41 }
 0x44b   : > { %v1658_v62 = vmul.f32 %v3489_v23, %v3435_v56  ;;  %v1657_v2 = vmul.f32 %v3491_v11, %v3451_v49  ;;  %v1735_v11 = vsel %vm1514_vm8, %v1728_v47, 0.0 }
 0x44d   : > { %v1671_v26 = vsel %vm1514_vm8, %v1658_v62, 0.0  ;;  %v1664_v61 = vsel %vm1514_vm8, %v1657_v2, 0.0 }
 0x44e   : > { %v3524_v50 = vpop.permute.xlu1 %1712  ;;  %v3526_v24 = vpop.permute.xlu0 %1710  ;;  %v1672_v2 = vadd.f32 %v1671_v26, %v1670_v19  ;;  %v1743_v19 = vadd.f32 %v1742_v42, %v1741_v55  ;;  %v1884_v55 = vld [vmem:[#allocation3 + $0x22] sm:$0xff] }
 0x44f   : > { %v1730_v22 = vmul.f32 %v3526_v24, %v3451_v49 }
 0x452   : > { %v3554_v6 = vpop.permute.xlu1 %1785  ;;  %v3556_v4 = vpop.permute.xlu0 %1783 }
 0x453   : > { %v1803_v28 = vmul.f32 %v3556_v4, %v3451_v49 }
 0x456   : > { %v1497_v3 = vpop.permute.xlu1 %1496  ;;  %v1495_v20 = vpop.permute.xlu0 %1494 }
 0x457   : > { %v1513_v38 = vmul.f32 %v1497_v3, %v3437_v5  ;;  %v1512_v53 = vmul.f32 %v1495_v20, %v3461_v34  ;;  %v1592_v3 = vadd.f32 %v1591_v30, %v1590_v58  ;;  %v1731_v20 = vmul.f32 %v3524_v50, %v3435_v56 }
 0x458   : > { %v1800_v58 = vmul.f32 %v3411_v51, %v3427_v0  ;;  %v1799_v50 = vmul.f32 %v3413_v13, %v3429_v1  ;;  %v1737_v13 = vsel %vm1514_vm8, %v1730_v22, 0.0 }
 0x459   : > { %v1527_v35 = vsel %vm1514_vm8, %v1513_v38, 0.0  ;;  %v1520_v36 = vsel %vm1514_vm8, %v1512_v53, 0.0  ;;  %v1744_v51 = vsel %vm1514_vm8, %v1731_v20, 0.0 }
 0x45a   : > { %v1528_v25 = vadd.f32 %v1527_v35, %v1526_v60  ;;  %v1521_v40 = vadd.f32 %v1520_v36, %v1519_v39  ;;  %v1571_v52 = vpop.permute.xlu1 %1570  ;;  %v1569_v46 = vpop.permute.xlu0 %1568  ;;  %v1802_v39 = vmul.f32 %v3415_v14, %v3419_v63  ;;  %v1665_v35 = vadd.f32 %v1664_v61, %v1663_v18 }
 0x45b   : > { %v1587_v23 = vmul.f32 %v1571_v52, %v3437_v5  ;;  %v1586_v59 = vmul.f32 %v1569_v46, %v3461_v34  ;;  %v1804_v14 = vmul.f32 %v3554_v6, %v3435_v56  ;;  %v1736_v18 = vadd.f32 %v1735_v11, %v1734_v21  ;;  %v1883_v21 = vld [vmem:[#allocation3 + $0x1a] sm:$0xff] }
 0x45c   : > { %1533 = vrot.lane.b32.xlu1 %v1528_v25, %s2369_s29  ;;  %1531 = vrot.lane.b32.xlu0 %v1521_v40, %s2369_s29  ;;  %v1814_v4 = vsel %vm1514_vm8, %v1800_v58, 0.0  ;;  %v1807_v20 = vsel %vm1514_vm8, %v1799_v50, 0.0  ;;  %v1745_v22 = vadd.f32 %v1744_v51, %v1743_v19  ;;  %v1810_v11 = vsel %vm1514_vm8, %v1803_v28, 0.0  ;;  %v1887_v28 = vld [vmem:[#allocation3 + $0x4a] sm:$0xff] }
 0x45d   : > { %v1600_v15 = vsel %vm1514_vm8, %v1587_v23, 0.0  ;;  %v1593_v38 = vsel %vm1514_vm8, %v1586_v59, 0.0  ;;  %v1815_v23 = vsel %vm1514_vm8, %v1802_v39, 0.0  ;;  %v1808_v59 = vsel %vm1514_vm8, %v1801_v32, 0.0  ;;  %v1885_v39 = vld [vmem:[#allocation3 + $0x32] sm:$0xff] }
 0x45e   : > { %v1601_v47 = vadd.f32 %v1600_v15, %v1599_v27  ;;  %v1594_v24 = vadd.f32 %v1593_v38, %v1592_v3  ;;  %v1644_v53 = vpop.permute.xlu1 %1643  ;;  %v1642_v60 = vpop.permute.xlu0 %1641  ;;  %v1738_v26 = vadd.f32 %v1737_v13, %v1736_v18  ;;  %v1817_v42 = vsel %vm1514_vm8, %v1804_v14, 0.0  ;;  %v1886_v38 = vld [vmem:[#allocation3 + $0x3a] sm:$0xff] }
 0x45f   : > { %v1660_v30 = vmul.f32 %v1644_v53, %v3437_v5  ;;  %v1659_v62 = vmul.f32 %v1642_v60, %v3461_v34  ;;  %v1816_v58 = vadd.f32 %v1815_v23, %v1814_v4  ;;  %v1859_v13 = vsel %vm217_vm1, %v3530_v54, 0.0 }
 0x460   : > { %1606 = vrot.lane.b32.xlu1 %v1601_v47, %s2369_s29  ;;  %1604 = vrot.lane.b32.xlu0 %v1594_v24, %s2369_s29  ;;  %v1809_v47 = vadd.f32 %v1808_v59, %v1807_v20  ;;  %v1894_v14 = vmul.f32 %v1886_v38, %v3435_v56  ;;  %v1889_v19 = vmul.f32 %v3288_v31, %v3429_v1  ;;  %v3835_v38 = vld [vmem:[#allocation11_spill] sm:$0xff] }
 0x461   : > { %v1673_v36 = vsel %vm1514_vm8, %v1660_v30, 0.0  ;;  %v1666_v25 = vsel %vm1514_vm8, %v1659_v62, 0.0  ;;  %v1892_v62 = vmul.f32 %v1884_v55, %v3419_v63  ;;  %v1893_v18 = vmul.f32 %v1885_v39, %v3451_v49  ;;  %v3838_v39 = vld [vmem:[#allocation12_spill] sm:$0xff] }
 0x462   : > { %v1674_v40 = vadd.f32 %v1673_v36, %v1672_v2  ;;  %v1667_v52 = vadd.f32 %v1666_v25, %v1665_v35  ;;  %v1717_v46 = vpop.permute.xlu1 %1716  ;;  %v1715_v27 = vpop.permute.xlu0 %1714  ;;  %v1891_v2 = vmul.f32 %v1883_v21, %v3421_v41  ;;  %v1818_v35 = vadd.f32 %v1817_v42, %v1816_v58  ;;  %v3836_v58 = vld [vmem:[#allocation10_spill] sm:$0xff] }
 0x463   : > { %v1733_v3 = vmul.f32 %v1717_v46, %v3437_v5  ;;  %v1732_v6 = vmul.f32 %v1715_v27, %v3461_v34  ;;  %v1811_v51 = vadd.f32 %v1810_v11, %v1809_v47  ;;  %v1868_v46 = vsel %vm217_vm1, %v3500_v17, 0.0 }
 0x464   : > { %1679 = vrot.lane.b32.xlu1 %v1674_v40, %s2369_s29  ;;  %1677 = vrot.lane.b32.xlu0 %v1667_v52, %s2369_s29  ;;  %v1858_v54 = vadd.f32 %v3562_v45, %v3559_v16  ;;  %v1861_v27 = vsel %vm217_vm1, %v3534_v48, 0.0  ;;  %v1905_v23 = vsel %vm217_vm1, %v1892_v62, 0.0  ;;  %v1895_v59 = vmul.f32 %v1887_v28, %v3461_v34  ;;  %v3840_v62 = vld [vmem:[#allocation15_spill] sm:$0xff] }
 0x465   : > { %v1746_v61 = vsel %vm1514_vm8, %v1733_v3, 0.0  ;;  %v1739_v15 = vsel %vm1514_vm8, %v1732_v6, 0.0  ;;  %v1898_v3 = vsel %vm217_vm1, %v1891_v2, 0.0  ;;  %v1867_v31 = vadd.f32 %v3516_v7, %v3513_v12 }
 0x466   : > { %v1747_v50 = vadd.f32 %v1746_v61, %v1745_v22  ;;  %v1740_v24 = vadd.f32 %v1739_v15, %v1738_v26  ;;  %v1790_v53 = vpop.permute.xlu1 %1789  ;;  %v1788_v60 = vpop.permute.xlu0 %1787  ;;  %v1860_v17 = vadd.f32 %v1859_v13, %v1858_v54  ;;  %v1941_v16 = vsel %vm217_vm1, %v3471_v37, 0.0  ;;  %v3833_v15 = vld [vmem:[#allocation21_spill] sm:$0xff] }
 0x467   : > { %v1806_v32 = vmul.f32 %v1790_v53, %v3437_v5  ;;  %v1805_v30 = vmul.f32 %v1788_v60, %v3461_v34  ;;  %v1971_v48 = vmul.f32 %v3429_v1, %v3176_v43  ;;  %v1904_v45 = vsel %vm217_vm1, %v3520_v57, 0.0 }
 0x468   : > { %1752 = vrot.lane.b32.xlu1 %v1747_v50, %s2369_s29  ;;  %1750 = vrot.lane.b32.xlu0 %v1740_v24, %s2369_s29  ;;  %v1907_v6 = vsel %vm217_vm1, %v1894_v14, 0.0  ;;  %v1897_v4 = vsel %vm217_vm1, %v1889_v19, 0.0  ;;  %v1900_v20 = vsel %vm217_vm1, %v1893_v18, 0.0  ;;  %v1869_v22 = vadd.f32 %v1868_v46, %v1867_v31  ;;  %v3837_v50 = vld [vmem:[#allocation22_spill] sm:$0xff]  ;;  %v3843_v18 = vld [vmem:[#allocation17_spill] sm:$0xff] }
 0x469   : > { %v1819_v36 = vsel %vm1514_vm8, %v1806_v32, 0.0  ;;  %v1812_v25 = vsel %vm1514_vm8, %v1805_v30, 0.0  ;;  %v1862_v26 = vadd.f32 %v1861_v27, %v1860_v17  ;;  %v1906_v55 = vadd.f32 %v1905_v23, %v1904_v45  ;;  %v3839_v32 = vld [vmem:[#allocation24_spill] sm:$0xff] }
 0x46a   : > { %v1820_v40 = vadd.f32 %v1819_v36, %v1818_v35  ;;  %v1813_v52 = vadd.f32 %v1812_v25, %v1811_v51  ;;  %v1899_v12 = vadd.f32 %v1898_v3, %v1897_v4  ;;  %v1902_v7 = vsel %vm217_vm1, %v1895_v59, 0.0  ;;  %v3841_v35 = vld [vmem:[#allocation16_spill] sm:$0xff]  ;;  %v3842_v36 = vld [vmem:[#allocation13_spill] sm:$0xff]  ;;  %v3846_v3 = vld [vmem:[#allocation19_spill] sm:$0xff] }
 0x46b   : > { %v1949_v37 = vadd.f32 %v3481_v29, %v3467_v10  ;;  %v1950_v43 = vsel %vm217_vm1, %v3465_v9, 0.0  ;;  %v1973_v57 = vmul.f32 %v3421_v41, %v3184_v44  ;;  %v1908_v21 = vadd.f32 %v1907_v6, %v1906_v55  ;;  %v3834_v29 = vld [vmem:[#allocation23_spill] sm:$0xff]  ;;  %v3847_v17 = vld [vmem:[#allocation20_spill] sm:$0xff] }
 0x46c   : > { %1825 = vrot.lane.b32.xlu1 %v1820_v40, %s2369_s29  ;;  %1823 = vrot.lane.b32.xlu0 %v1813_v52, %s2369_s29  ;;  %v1901_v42 = vadd.f32 %v1900_v20, %v1899_v12  ;;  %v1976_v11 = vmul.f32 %v3435_v56, %v3190_v8  ;;  %v1986_v61 = vsel %vm217_vm1, %v3459_v33, 0.0  ;;  %v1942_v10 = vadd.f32 %v1941_v16, %v3833_v15  ;;  %v3844_v40 = vld [vmem:[#allocation14_spill] sm:$0xff] }
 0x46d   : > { %v1943_v9 = vsel %vm217_vm1, %v3834_v29, 0.0  ;;  %v1978_v44 = vmul.f32 %v3437_v5, %v3835_v38  ;;  %v1975_v47 = vmul.f32 %v3451_v49, %v3836_v58  ;;  %v1910_v24 = vadd.f32 %v3837_v50, %v1908_v21  ;;  %v3845_v52 = vld [vmem:[#allocation18_spill] sm:$0xff] }
 0x46e   : > { %v1903_v53 = vadd.f32 %v1902_v7, %v1901_v42  ;;  %v1951_v60 = vadd.f32 %v1950_v43, %v1949_v37  ;;  %v1977_v8 = vmul.f32 %v3461_v34, %v3838_v39  ;;  %v1987_v33 = vsel %vm217_vm1, %v3839_v32, 0.0 }
 0x46f   : > { %v1980_v30 = vsel %vm217_vm1, %v1973_v57, 0.0  ;;  %v2015_v2 = vmul.f32 %v3419_v63, %v3840_v62  ;;  %v2014_v51 = vmul.f32 %v3421_v41, %v3841_v35  ;;  %v1944_v13 = vadd.f32 %v1943_v9, %v1942_v10 }
 0x470   : > { %1874 = vrot.lane.b32.xlu1 %v1869_v22, %s2369_s29  ;;  %1872 = vrot.lane.b32.xlu0 %v1862_v26, %s2369_s29  ;;  %v1989_v14 = vsel %vm217_vm1, %v1976_v11, 0.0  ;;  %v1979_v28 = vsel %vm217_vm1, %v1971_v48, 0.0  ;;  %v2013_v25 = vmul.f32 %v3427_v0, %v3842_v36  ;;  %v1982_v19 = vsel %vm217_vm1, %v1975_v47, 0.0 }
 0x471   : > { %v2017_v63 = vmul.f32 %v3435_v56, %v3843_v18  ;;  %v2012_v41 = vmul.f32 %v3429_v1, %v3844_v40  ;;  %v2016_v46 = vmul.f32 %v3451_v49, %v3845_v52  ;;  %v1988_v54 = vadd.f32 %v1987_v33, %v1986_v61 }
 0x472   : > { %v1991_v27 = vsel %vm217_vm1, %v1978_v44, 0.0  ;;  %v1981_v23 = vadd.f32 %v1980_v30, %v1979_v28  ;;  %v1984_v59 = vsel %vm217_vm1, %v1977_v8, 0.0  ;;  %v2019_v0 = vmul.f32 %v3437_v5, %v3846_v3 }
 0x473   : > { %v2028_v31 = vsel %vm217_vm1, %v2015_v2, 0.0  ;;  %v2018_v56 = vmul.f32 %v3461_v34, %v3847_v17  ;;  %v2021_v16 = vsel %vm217_vm1, %v2014_v51, 0.0  ;;  %v1990_v49 = vadd.f32 %v1989_v14, %v1988_v54 }
 0x474   : > { %1915 = vrot.lane.b32.xlu1 %v1910_v24, %s2369_s29  ;;  %1913 = vrot.lane.b32.xlu0 %v1903_v53, %s2369_s29  ;;  %v1983_v1 = vadd.f32 %v1982_v19, %v1981_v23  ;;  %v2027_v48 = vsel %vm217_vm1, %v2013_v25, 0.0  ;;  %v2030_v45 = vsel %vm217_vm1, %v2017_v63, 0.0  ;;  %v2020_v6 = vsel %vm217_vm1, %v2012_v41, 0.0 }
 0x475   : > { %v2023_v5 = vsel %vm217_vm1, %v2016_v46, 0.0  ;;  %v1992_v4 = vadd.f32 %v1991_v27, %v1990_v49  ;;  %v2029_v34 = vadd.f32 %v2028_v31, %v2027_v48  ;;  %v2022_v22 = vadd.f32 %v2021_v16, %v2020_v6 }
 0x476   : > { %v1985_v20 = vadd.f32 %v1984_v59, %v1983_v1  ;;  %v2032_v26 = vsel %vm217_vm1, %v2019_v0, 0.0  ;;  %v2025_v55 = vsel %vm217_vm1, %v2018_v56, 0.0 }
 0x477   : > { %v2031_v12 = vadd.f32 %v2030_v45, %v2029_v34  ;;  %v2024_v7 = vadd.f32 %v2023_v5, %v2022_v22 }
 0x478   : > { %1956 = vrot.lane.b32.xlu1 %v1951_v60, %s2369_s29  ;;  %1954 = vrot.lane.b32.xlu0 %v1944_v13, %s2369_s29 }
 0x479   : > { %v2033_v37 = vadd.f32 %v2032_v26, %v2031_v12  ;;  %v2026_v43 = vadd.f32 %v2025_v55, %v2024_v7 }
 0x47c   : > { %1997 = vrot.lane.b32.xlu1 %v1992_v4, %s2369_s29  ;;  %1995 = vrot.lane.b32.xlu0 %v1985_v20, %s2369_s29 }
 0x480   : > { %2038 = vrot.lane.b32.xlu1 %v2033_v37, %s2369_s29  ;;  %2036 = vrot.lane.b32.xlu0 %v2026_v43, %s2369_s29 }
 0x48e   : > { %v1452_v57 = vpop.permute.xlu1 %1451  ;;  %v1450_v21 = vpop.permute.xlu0 %1449 }
 0x48f   : > { %2175 = vst.msk [vmem:[%s3030_s26 + $0x168] sm:$0xff] %vm415_vm7, %v1452_v57  ;;  %2174 = vst.msk [vmem:[%s3030_s26 + $0x160] sm:$0xff] %vm415_vm7, %v1450_v21 }
 0x4ce   : > { %v1534_v42 = vpop.permute.xlu1 %1533  ;;  %v1532_v11 = vpop.permute.xlu0 %1531 }
 0x4cf   : > { %2177 = vst.msk [vmem:[%s3030_s26 + $0x38] sm:$0xff] %vm415_vm7, %v1534_v42  ;;  %2176 = vst.msk [vmem:[%s3030_s26 + $0x30] sm:$0xff] %vm415_vm7, %v1532_v11 }
 0x4d2   : > { %v1607_v61 = vpop.permute.xlu1 %1606  ;;  %v1605_v15 = vpop.permute.xlu0 %1604 }
 0x4d3   : > { %2179 = vst.msk [vmem:[%s3030_s26 + $0x88] sm:$0xff] %vm415_vm7, %v1607_v61  ;;  %2178 = vst.msk [vmem:[%s3030_s26 + $0x80] sm:$0xff] %vm415_vm7, %v1605_v15 }
 0x4d6   : > { %v1680_v10 = vpop.permute.xlu1 %1679  ;;  %v1678_v29 = vpop.permute.xlu0 %1677 }
 0x4d7   : > { %2181 = vst.msk [vmem:[%s3030_s26 + $0xd8] sm:$0xff] %vm415_vm7, %v1680_v10  ;;  %2180 = vst.msk [vmem:[%s3030_s26 + $0xd0] sm:$0xff] %vm415_vm7, %v1678_v29 }
 0x4da   : > { %v1753_v9 = vpop.permute.xlu1 %1752  ;;  %v1751_v38 = vpop.permute.xlu0 %1750 }
 0x4db   : > { %2183 = vst.msk [vmem:[%s3030_s26 + $0x128] sm:$0xff] %vm415_vm7, %v1753_v9  ;;  %2182 = vst.msk [vmem:[%s3030_s26 + $0x120] sm:$0xff] %vm415_vm7, %v1751_v38 }
 0x4de   : > { %v1826_v44 = vpop.permute.xlu1 %1825  ;;  %v1824_v58 = vpop.permute.xlu0 %1823 }
 0x4df   : > { %2185 = vst.msk [vmem:[%s3030_s26 + $0x178] sm:$0xff] %vm415_vm7, %v1826_v44  ;;  %2184 = vst.msk [vmem:[%s3030_s26 + $0x170] sm:$0xff] %vm415_vm7, %v1824_v58 }
 0x4e2   : > { %v1875_v47 = vpop.permute.xlu1 %1874  ;;  %v1873_v50 = vpop.permute.xlu0 %1872 }
 0x4e3   : > { %2187 = vst.msk [vmem:[%s3030_s26 + $0x48] sm:$0xff] %vm415_vm7, %v1875_v47  ;;  %2186 = vst.msk [vmem:[%s3030_s26 + $0x40] sm:$0xff] %vm415_vm7, %v1873_v50 }
 0x4e6   : > { %v1916_v24 = vpop.permute.xlu1 %1915  ;;  %v1914_v53 = vpop.permute.xlu0 %1913 }
 0x4e7   : > { %2189 = vst.msk [vmem:[%s3030_s26 + $0x98] sm:$0xff] %vm415_vm7, %v1916_v24  ;;  %2188 = vst.msk [vmem:[%s3030_s26 + $0x90] sm:$0xff] %vm415_vm7, %v1914_v53 }
 0x4ea   : > { %v1957_v60 = vpop.permute.xlu1 %1956  ;;  %v1955_v39 = vpop.permute.xlu0 %1954 }
 0x4eb   : > { %2191 = vst.msk [vmem:[%s3030_s26 + $0xe8] sm:$0xff] %vm415_vm7, %v1957_v60  ;;  %2190 = vst.msk [vmem:[%s3030_s26 + $0xe0] sm:$0xff] %vm415_vm7, %v1955_v39 }
 0x4ee   : > { %v1998_v8 = vpop.permute.xlu1 %1997  ;;  %v1996_v32 = vpop.permute.xlu0 %1995 }
 0x4ef   : > { %2193 = vst.msk [vmem:[%s3030_s26 + $0x138] sm:$0xff] %vm415_vm7, %v1998_v8  ;;  %2192 = vst.msk [vmem:[%s3030_s26 + $0x130] sm:$0xff] %vm415_vm7, %v1996_v32 }
 0x4f2   : > { %v2039_v33 = vpop.permute.xlu1 %2038  ;;  %v2037_v30 = vpop.permute.xlu0 %2036 }
 0x4f3   : > { %2195 = vst.msk [vmem:[%s3030_s26 + $0x188] sm:$0xff] %vm415_vm7, %v2039_v33  ;;  %2194 = vst.msk [vmem:[%s3030_s26 + $0x180] sm:$0xff] %vm415_vm7, %v2037_v30 }
 0x4f4 PF: > { %p15_p11 = scmp.ge.s32.totalorder %s2408_s14, 4   ;;  %s3848_s9 = smov %s2351_s10 }
 0x4f5   : > { %s3849_s10 = smov %s2355_s11  ;;  %s3850_s11 = smov %s2418_s17 }
 0x4f6   : > { %s3851_s12 = smov %s2408_s14  ;;  %17 = sbr.rel (!%p15_p11) target bundleno = 5 (0x5), region = 105 }
 0x4fd   :  { %2066 = vsyncpa [#allocation5], 1 }
 0x4fe   :  { %2068 = vsyncpa [#allocation5 + $0x1], 1 }
 0x4ff   :  { %2069 = vsyncpa [#allocation7], 1 }
 0x500   :  { %2071 = vsyncpa [#allocation7 + $0x1], 1 }

</bundles_post_ra>
